<compile_context>
chip_gen: v6e
topology: v6e:2x2x1
jax: 0.10.0
libtpu: 0.0.40
codegen_flags: <defaults>
</compile_context>

<pallas_src>
import functools

import jax
import jax.numpy as jnp
from jax import lax
from jax.experimental import pallas as pl
from jax.experimental.pallas import tpu as pltpu


def _bf16_elementwise_ok():
    """bf16 VPU/EUP exists on v6e and later; keep f32 elementwise math on <=v5."""
    try:
        kind = (jax.devices()[0].device_kind or "").lower()
    except Exception:
        return False
    return not any(tag in kind for tag in ("v2", "v3", "v4", "v5"))


# ---------------------------------------------------------------------------
# Fused kernel (one grid step = NB batch elements on a (C, NB*HW) lane axis)
# ---------------------------------------------------------------------------
def _make_fused_kernel(C, H, W, NB, exp_dtype):
    HW = H * W
    L = NB * HW
    C3 = 3 * C
    scale = 1.0 / float(H)  # torch: attn = q^T k / window_size (window == full block)
    CENTER = 4              # tap (kh,kw) = (1,1)
    # tap t = kh*3+kw reads flat index p + s, s = (kh-1)*W + (kw-1);
    # pltpu.roll follows jnp.roll semantics -> shift = (-s) mod L.
    offs = [(kh - 1) * W + (kw - 1) for kh in range(3) for kw in range(3)]
    shifts = [(-s) % L for s in offs]

    def kernel(x_ref, m_ref, wqkv_ref, bqkv_ref, wdw_ref, bdw_ref,
               wpr_ref, bpr_ref, o_ref, stack_ref):
        # ---- qkv 1x1 conv -------------------------------------------------
        x = x_ref[...].astype(jnp.float32)                                  # (C, L)
        qkv = jnp.dot(wqkv_ref[...], x,
                      preferred_element_type=jnp.float32) + bqkv_ref[...]   # (C3, L)

        # ---- depthwise 3x3 conv via lane rolls + boundary masks ------------
        acc = qkv * wdw_ref[CENTER]          # center tap: no roll, all-ones mask
        for t in range(9):
            if t == CENTER:
                continue
            tap = pltpu.roll(qkv, shift=shifts[t], axis=1)
            acc = acc + (tap * m_ref[t:t + 1, :]) * wdw_ref[t]
        qkv_dw = acc + bdw_ref[...]                                          # (C3, L)

        q = qkv_dw[0:C, :]
        k = qkv_dw[C:2 * C, :]
        v = qkv_dw[2 * C:3 * C, :]

        # ---- pixel-wise attention (per batch element inside the block) -----
        out_parts = []
        for b in range(NB):
            sl = slice(b * HW, (b + 1) * HW)
            qb, kb, vb = q[:, sl], k[:, sl], v[:, sl]
            # torch F.normalize(dim=-1): x * rsqrt(max(sum_sq, 1e-24));
            # 1/window_size temperature folded into qn (C*HW mul, not HW^2).
            qn = qb * (lax.rsqrt(jnp.maximum(jnp.sum(qb * qb, axis=-1,
                                                     keepdims=True), 1e-24)) * scale)
            kn = kb * lax.rsqrt(jnp.maximum(jnp.sum(kb * kb, axis=-1,
                                                    keepdims=True), 1e-24))
            # Transposed logits: attn_t[m, n] = sum_c kn[c,m] qn[c,n].
            attn_t = lax.dot_general(kn.astype(jnp.bfloat16), qn.astype(jnp.bfloat16),
                                     (((0,), (0,)), ((), ())),
                                     preferred_element_type=jnp.float32)     # (HWm, HWn)
            # Softmax over m: logits bounded (|.| <= 1/window_size) -> no max-sub.
            e = jnp.exp(attn_t.astype(exp_dtype))
            denom = jnp.sum(e.astype(jnp.float32), axis=0, keepdims=True)    # (1, HWn)
            inv = pl.reciprocal(denom, approx=True)
            vs = (vb * inv).astype(jnp.bfloat16)                             # (C, HWn)
            # out[c, m] = sum_n v[c,n] * inv[n] * e[m,n]
            ob = lax.dot_general(vs, e.astype(jnp.bfloat16),
                                 (((1,), (1,)), ((), ())),
                                 preferred_element_type=jnp.float32)         # (C, HWm)
            out_parts.append(ob)
        out = out_parts[0] if NB == 1 else jnp.concatenate(out_parts, axis=1)  # (C, L)

        # ---- 3x3 project_out: stack 9 taps -> single K = 9*C MXU matmul -----
        for t in range(9):
            if t == CENTER:
                tap = out
            else:
                tap = pltpu.roll(out, shift=shifts[t], axis=1) * m_ref[t:t + 1, :]
            stack_ref[t * C:(t + 1) * C, :] = tap
        y = jnp.dot(wpr_ref[...], stack_ref[...],
                    preferred_element_type=jnp.float32) + bpr_ref[...]        # (C, L)
        o_ref[...] = y.astype(o_ref.dtype)

    return kernel


# ---------------------------------------------------------------------------
# Wrapper: parameter packing + pallas_call
# ---------------------------------------------------------------------------
@functools.partial(jax.jit, static_argnames=("batch_block",))
def pixelwise_self_attention(x, params, *, batch_block=None):
    W_qkv, b_qkv, W_dw, b_dw, W_pr, b_pr = params
    B, C, H, W = x.shape
    HW = H * W
    C3 = 3 * C

    # Batches per grid step: amortize the tiny (K=C) matmuls across batches,
    # but keep >=2 grid steps (v7x dual TensorCore) and bound attention VMEM.
    if batch_block is None:
        NB = 1
        if HW <= 1024:
            for cand in (4, 3, 2):
                if B % cand == 0 and B // cand >= 2:
                    NB = cand
                    break
    else:
        NB = batch_block if (B % batch_block == 0) else 1
    L = NB * HW

    # Boundary masks for the 9 taps on the flattened (H*W) axis, tiled per batch.
    idx = jnp.arange(HW, dtype=jnp.int32)
    row = idx // W
    col = idx % W
    masks = []
    for kh in range(3):
        for kw in range(3):
            ok = ((row + (kh - 1) >= 0) & (row + (kh - 1) <= H - 1) &
                  (col + (kw - 1) >= 0) & (col + (kw - 1) <= W - 1))
            masks.append(ok.astype(jnp.float32))
    masks = jnp.tile(jnp.stack(masks, axis=0), (1, NB))                 # (9, L)

    wqkv = W_qkv.reshape(C3, C)
    bqkv = b_qkv.reshape(C3, 1)
    # depthwise weights: wdw[t, c, 0] = W_dw[c, 0, kh, kw], t = kh*3+kw
    wdw = jnp.transpose(W_dw.reshape(C3, 9), (1, 0)).reshape(9, C3, 1)
    bdw = b_dw.reshape(C3, 1)
    # project_out weights flattened for the K=9*C matmul:
    # wpr[co, t*C + ci] = W_pr[co, ci, kh, kw], t = kh*3+kw
    wpr = jnp.transpose(W_pr, (0, 2, 3, 1)).reshape(C, 9 * C)
    bpr = b_pr.reshape(C, 1)

    # Lane-dense layout: (C, B*HW); grid steps over lane blocks of NB batches.
    x_flat = jnp.transpose(x.reshape(B, C, HW), (1, 0, 2)).reshape(C, B * HW)

    # Explicit scoped-VMEM limit (defaults: 16 MiB v5e / 32 MiB v6e,v7x).
    attn_bytes = (4 + 4 + 4 + 2) * HW * HW          # logits f32, e, f32 copy, bf16 copy
    chan_bytes = 24 * C3 * L * 4                     # qkv/dwconv/q,k,v temporaries
    io_bytes = 4 * (C * L + 9 * L + 9 * C * L) * 4   # I/O double buffers + tap stack
    est = NB * attn_bytes + chan_bytes + io_bytes
    vmem_limit = int(min(64 * 2 ** 20, max(16 * 2 ** 20, 2 * est)))

    exp_dtype = jnp.bfloat16 if _bf16_elementwise_ok() else jnp.float32
    kernel = _make_fused_kernel(C, H, W, NB, exp_dtype)

    y_flat = pl.pallas_call(
        kernel,
        out_shape=jax.ShapeDtypeStruct((C, B * HW), x.dtype),
        grid=(B // NB,),
        in_specs=[
            pl.BlockSpec((C, L), lambda i: (0, i)),         # x (lane-blocked batches)
            pl.BlockSpec((9, L), lambda i: (0, 0)),         # boundary masks
            pl.BlockSpec((C3, C), lambda i: (0, 0)),        # W_qkv
            pl.BlockSpec((C3, 1), lambda i: (0, 0)),        # b_qkv
            pl.BlockSpec((9, C3, 1), lambda i: (0, 0, 0)),  # W_dw
            pl.BlockSpec((C3, 1), lambda i: (0, 0)),        # b_dw
            pl.BlockSpec((C, 9 * C), lambda i: (0, 0)),     # W_pr (K = 9*C)
            pl.BlockSpec((C, 1), lambda i: (0, 0)),         # b_pr
        ],
        out_specs=pl.BlockSpec((C, L), lambda i: (0, i)),
        scratch_shapes=[pltpu.VMEM((9 * C, L), jnp.float32)],   # project_out tap stack
        compiler_params=pltpu.CompilerParams(
            dimension_semantics=("parallel",),
            vmem_limit_bytes=vmem_limit),
    )(x_flat, masks, wqkv, bqkv, wdw, bdw, wpr, bpr)

    return jnp.transpose(y_flat.reshape(C, B, HW), (1, 0, 2)).reshape(B, C, H, W)


# ---------------------------------------------------------------------------
# Pure-JAX reference (matches the PyTorch forward semantics of this block)
# ---------------------------------------------------------------------------
def reference_forward(x, params):
    W_qkv, b_qkv, W_dw, b_dw, W_pr, b_pr = params
    B, C, H, W = x.shape
    C3 = 3 * C
    dn = ('NCHW', 'OIHW', 'NCHW')
    qkv = lax.conv_general_dilated(x, W_qkv, (1, 1), 'VALID', dimension_numbers=dn)
    qkv = qkv + b_qkv[None, :, None, None]
    qkv = lax.conv_general_dilated(qkv, W_dw, (1, 1), ((1, 1), (1, 1)),
                                   dimension_numbers=dn, feature_group_count=C3)
    qkv = qkv + b_dw[None, :, None, None]
    q, k, v = jnp.split(qkv.reshape(B, C3, H * W), 3, axis=1)
    qn = q / jnp.maximum(jnp.linalg.norm(q, axis=-1, keepdims=True), 1e-12)
    kn = k / jnp.maximum(jnp.linalg.norm(k, axis=-1, keepdims=True), 1e-12)
    attn = jnp.einsum('bcn,bcm->bnm', qn, kn) / H      # temperature = 1/window_size
    attn = jax.nn.softmax(attn, axis=-1)
    out = jnp.einsum('bcn,bnm->bcm', v, attn)
    out = out.reshape(B, C, H, W)
    out = lax.conv_general_dilated(out, W_pr, (1, 1), ((1, 1), (1, 1)),
                                   dimension_numbers=dn)
    return out + b_pr[None, :, None, None]


if __name__ == "__main__":
    B, dim, H, W = 2, 4, 16, 16
    key = jax.random.PRNGKey(0)
    ks = jax.random.split(key, 7)
    x = jax.random.normal(ks[0], (B, dim, H, W), jnp.float32)
    # Deterministic synthetic parameters (bias=True), PyTorch weight shapes:
    W_qkv = 0.2 * jax.random.normal(ks[1], (3 * dim, dim, 1, 1), jnp.float32)
    b_qkv = 0.1 * jax.random.normal(ks[2], (3 * dim,), jnp.float32)
    W_dw = 0.2 * jax.random.normal(ks[3], (3 * dim, 1, 3, 3), jnp.float32)
    b_dw = 0.1 * jax.random.normal(ks[4], (3 * dim,), jnp.float32)
    W_pr = 0.2 * jax.random.normal(ks[5], (dim, dim, 3, 3), jnp.float32)
    b_pr = 0.1 * jax.random.normal(ks[6], (dim,), jnp.float32)
    params = (W_qkv, b_qkv, W_dw, b_dw, W_pr, b_pr)

    y = jax.block_until_ready(pixelwise_self_attention(x, params))
    y_ref = jax.block_until_ready(reference_forward(x, params))

    assert y.shape == (B, dim, H, W)
    assert jnp.allclose(y, y_ref, atol=2e-2, rtol=2e-2), float(jnp.max(jnp.abs(y - y_ref)))
    print("KERNEL_OK")
</pallas_src>

<mosaic_0001>
module attributes {stable_mosaic.version = 11 : i64} {
  func.func @kernel(%arg0: i32, %arg1: memref<4x256xf32, #tpu.memory_space<vmem>>, %arg2: memref<9x256xf32, #tpu.memory_space<vmem>>, %arg3: memref<12x4xf32, #tpu.memory_space<vmem>>, %arg4: memref<12x1xf32, #tpu.memory_space<vmem>>, %arg5: memref<9x12x1xf32, #tpu.memory_space<vmem>>, %arg6: memref<12x1xf32, #tpu.memory_space<vmem>>, %arg7: memref<4x36xf32, #tpu.memory_space<vmem>>, %arg8: memref<4x1xf32, #tpu.memory_space<vmem>>, %arg9: memref<4x256xf32, #tpu.memory_space<vmem>>, %arg10: memref<36x256xf32, #tpu.memory_space<vmem>>) attributes {dimension_semantics = [#tpu.dimension_semantics<parallel>], iteration_bounds = array<i64: 2>, scalar_prefetch = 0 : i64, scratch_operands = 1 : i64, tpu.core_type = #tpu.core_type<tc>, window_params = [{transform_indices = @transform_0, window_bounds = array<i64: 4, 256>}, {pipeline_mode = #tpu.pipeline_mode<synchronous>, transform_indices = @transform_1, window_bounds = array<i64: 9, 256>}, {pipeline_mode = #tpu.pipeline_mode<synchronous>, transform_indices = @transform_2, window_bounds = array<i64: 12, 4>}, {pipeline_mode = #tpu.pipeline_mode<synchronous>, transform_indices = @transform_3, window_bounds = array<i64: 12, 1>}, {pipeline_mode = #tpu.pipeline_mode<synchronous>, transform_indices = @transform_4, window_bounds = array<i64: 9, 12, 1>}, {pipeline_mode = #tpu.pipeline_mode<synchronous>, transform_indices = @transform_5, window_bounds = array<i64: 12, 1>}, {pipeline_mode = #tpu.pipeline_mode<synchronous>, transform_indices = @transform_6, window_bounds = array<i64: 4, 36>}, {pipeline_mode = #tpu.pipeline_mode<synchronous>, transform_indices = @transform_7, window_bounds = array<i64: 4, 1>}, {transform_indices = @transform_8, window_bounds = array<i64: 4, 256>}]} {
    %c0 = arith.constant 0 : index
    %c0_0 = arith.constant 0 : index
    %0 = vector.load %arg1[%c0, %c0_0] : memref<4x256xf32, #tpu.memory_space<vmem>>, vector<4x256xf32>
    %c0_1 = arith.constant 0 : index
    %c0_2 = arith.constant 0 : index
    %1 = vector.load %arg3[%c0_1, %c0_2] : memref<12x4xf32, #tpu.memory_space<vmem>>, vector<12x4xf32>
    %cst = arith.constant dense<0.000000e+00> : vector<12x256xf32>
    %2 = tpu.matmul %1, %0, %cst {dimension_numbers = #tpu.dot_dimension_numbers<[1], [0], [0], [1], [0, 0, 1, 1], [], []>} : vector<12x4xf32>, vector<4x256xf32>, vector<12x256xf32> -> vector<12x256xf32>
    %c0_3 = arith.constant 0 : index
    %c0_4 = arith.constant 0 : index
    %3 = vector.load %arg4[%c0_3, %c0_4] : memref<12x1xf32, #tpu.memory_space<vmem>>, vector<12x1xf32>
    %4 = vector.broadcast %3 : vector<12x1xf32> to vector<12x256xf32>
    %5 = arith.addf %2, %4 : vector<12x256xf32>
    %c4 = arith.constant 4 : index
    %c0_5 = arith.constant 0 : index
    %c0_6 = arith.constant 0 : index
    %6 = vector.load %arg5[%c4, %c0_5, %c0_6] : memref<9x12x1xf32, #tpu.memory_space<vmem>>, vector<1x12x1xf32>
    %7 = vector.shape_cast %6 : vector<1x12x1xf32> to vector<12x1xf32>
    %8 = vector.broadcast %7 : vector<12x1xf32> to vector<12x256xf32>
    %9 = arith.mulf %5, %8 : vector<12x256xf32>
    %c17_i32 = arith.constant 17 : i32
    %10 = tpu.dynamic_rotate %5 by %c17_i32 dim 1 : vector<12x256xf32>, i32 -> vector<12x256xf32>
    %c0_7 = arith.constant 0 : index
    %c0_8 = arith.constant 0 : index
    %11 = vector.load %arg2[%c0_7, %c0_8] : memref<9x256xf32, #tpu.memory_space<vmem>>, vector<1x256xf32>
    %12 = vector.broadcast %11 : vector<1x256xf32> to vector<12x256xf32>
    %13 = arith.mulf %10, %12 : vector<12x256xf32>
    %c0_9 = arith.constant 0 : index
    %c0_10 = arith.constant 0 : index
    %c0_11 = arith.constant 0 : index
    %14 = vector.load %arg5[%c0_9, %c0_10, %c0_11] : memref<9x12x1xf32, #tpu.memory_space<vmem>>, vector<1x12x1xf32>
    %15 = vector.shape_cast %14 : vector<1x12x1xf32> to vector<12x1xf32>
    %16 = vector.broadcast %15 : vector<12x1xf32> to vector<12x256xf32>
    %17 = arith.mulf %13, %16 : vector<12x256xf32>
    %18 = arith.addf %9, %17 : vector<12x256xf32>
    %c16_i32 = arith.constant 16 : i32
    %19 = tpu.dynamic_rotate %5 by %c16_i32 dim 1 : vector<12x256xf32>, i32 -> vector<12x256xf32>
    %c1 = arith.constant 1 : index
    %c0_12 = arith.constant 0 : index
    %20 = vector.load %arg2[%c1, %c0_12] : memref<9x256xf32, #tpu.memory_space<vmem>>, vector<1x256xf32>
    %21 = vector.broadcast %20 : vector<1x256xf32> to vector<12x256xf32>
    %22 = arith.mulf %19, %21 : vector<12x256xf32>
    %c1_13 = arith.constant 1 : index
    %c0_14 = arith.constant 0 : index
    %c0_15 = arith.constant 0 : index
    %23 = vector.load %arg5[%c1_13, %c0_14, %c0_15] : memref<9x12x1xf32, #tpu.memory_space<vmem>>, vector<1x12x1xf32>
    %24 = vector.shape_cast %23 : vector<1x12x1xf32> to vector<12x1xf32>
    %25 = vector.broadcast %24 : vector<12x1xf32> to vector<12x256xf32>
    %26 = arith.mulf %22, %25 : vector<12x256xf32>
    %27 = arith.addf %18, %26 : vector<12x256xf32>
    %c15_i32 = arith.constant 15 : i32
    %28 = tpu.dynamic_rotate %5 by %c15_i32 dim 1 : vector<12x256xf32>, i32 -> vector<12x256xf32>
    %c2 = arith.constant 2 : index
    %c0_16 = arith.constant 0 : index
    %29 = vector.load %arg2[%c2, %c0_16] : memref<9x256xf32, #tpu.memory_space<vmem>>, vector<1x256xf32>
    %30 = vector.broadcast %29 : vector<1x256xf32> to vector<12x256xf32>
    %31 = arith.mulf %28, %30 : vector<12x256xf32>
    %c2_17 = arith.constant 2 : index
    %c0_18 = arith.constant 0 : index
    %c0_19 = arith.constant 0 : index
    %32 = vector.load %arg5[%c2_17, %c0_18, %c0_19] : memref<9x12x1xf32, #tpu.memory_space<vmem>>, vector<1x12x1xf32>
    %33 = vector.shape_cast %32 : vector<1x12x1xf32> to vector<12x1xf32>
    %34 = vector.broadcast %33 : vector<12x1xf32> to vector<12x256xf32>
    %35 = arith.mulf %31, %34 : vector<12x256xf32>
    %36 = arith.addf %27, %35 : vector<12x256xf32>
    %c1_i32 = arith.constant 1 : i32
    %37 = tpu.dynamic_rotate %5 by %c1_i32 dim 1 : vector<12x256xf32>, i32 -> vector<12x256xf32>
    %c3 = arith.constant 3 : index
    %c0_20 = arith.constant 0 : index
    %38 = vector.load %arg2[%c3, %c0_20] : memref<9x256xf32, #tpu.memory_space<vmem>>, vector<1x256xf32>
    %39 = vector.broadcast %38 : vector<1x256xf32> to vector<12x256xf32>
    %40 = arith.mulf %37, %39 : vector<12x256xf32>
    %c3_21 = arith.constant 3 : index
    %c0_22 = arith.constant 0 : index
    %c0_23 = arith.constant 0 : index
    %41 = vector.load %arg5[%c3_21, %c0_22, %c0_23] : memref<9x12x1xf32, #tpu.memory_space<vmem>>, vector<1x12x1xf32>
    %42 = vector.shape_cast %41 : vector<1x12x1xf32> to vector<12x1xf32>
    %43 = vector.broadcast %42 : vector<12x1xf32> to vector<12x256xf32>
    %44 = arith.mulf %40, %43 : vector<12x256xf32>
    %45 = arith.addf %36, %44 : vector<12x256xf32>
    %c255_i32 = arith.constant 255 : i32
    %46 = tpu.dynamic_rotate %5 by %c255_i32 dim 1 : vector<12x256xf32>, i32 -> vector<12x256xf32>
    %c5 = arith.constant 5 : index
    %c0_24 = arith.constant 0 : index
    %47 = vector.load %arg2[%c5, %c0_24] : memref<9x256xf32, #tpu.memory_space<vmem>>, vector<1x256xf32>
    %48 = vector.broadcast %47 : vector<1x256xf32> to vector<12x256xf32>
    %49 = arith.mulf %46, %48 : vector<12x256xf32>
    %c5_25 = arith.constant 5 : index
    %c0_26 = arith.constant 0 : index
    %c0_27 = arith.constant 0 : index
    %50 = vector.load %arg5[%c5_25, %c0_26, %c0_27] : memref<9x12x1xf32, #tpu.memory_space<vmem>>, vector<1x12x1xf32>
    %51 = vector.shape_cast %50 : vector<1x12x1xf32> to vector<12x1xf32>
    %52 = vector.broadcast %51 : vector<12x1xf32> to vector<12x256xf32>
    %53 = arith.mulf %49, %52 : vector<12x256xf32>
    %54 = arith.addf %45, %53 : vector<12x256xf32>
    %c241_i32 = arith.constant 241 : i32
    %55 = tpu.dynamic_rotate %5 by %c241_i32 dim 1 : vector<12x256xf32>, i32 -> vector<12x256xf32>
    %c6 = arith.constant 6 : index
    %c0_28 = arith.constant 0 : index
    %56 = vector.load %arg2[%c6, %c0_28] : memref<9x256xf32, #tpu.memory_space<vmem>>, vector<1x256xf32>
    %57 = vector.broadcast %56 : vector<1x256xf32> to vector<12x256xf32>
    %58 = arith.mulf %55, %57 : vector<12x256xf32>
    %c6_29 = arith.constant 6 : index
    %c0_30 = arith.constant 0 : index
    %c0_31 = arith.constant 0 : index
    %59 = vector.load %arg5[%c6_29, %c0_30, %c0_31] : memref<9x12x1xf32, #tpu.memory_space<vmem>>, vector<1x12x1xf32>
    %60 = vector.shape_cast %59 : vector<1x12x1xf32> to vector<12x1xf32>
    %61 = vector.broadcast %60 : vector<12x1xf32> to vector<12x256xf32>
    %62 = arith.mulf %58, %61 : vector<12x256xf32>
    %63 = arith.addf %54, %62 : vector<12x256xf32>
    %c240_i32 = arith.constant 240 : i32
    %64 = tpu.dynamic_rotate %5 by %c240_i32 dim 1 : vector<12x256xf32>, i32 -> vector<12x256xf32>
    %c7 = arith.constant 7 : index
    %c0_32 = arith.constant 0 : index
    %65 = vector.load %arg2[%c7, %c0_32] : memref<9x256xf32, #tpu.memory_space<vmem>>, vector<1x256xf32>
    %66 = vector.broadcast %65 : vector<1x256xf32> to vector<12x256xf32>
    %67 = arith.mulf %64, %66 : vector<12x256xf32>
    %c7_33 = arith.constant 7 : index
    %c0_34 = arith.constant 0 : index
    %c0_35 = arith.constant 0 : index
    %68 = vector.load %arg5[%c7_33, %c0_34, %c0_35] : memref<9x12x1xf32, #tpu.memory_space<vmem>>, vector<1x12x1xf32>
    %69 = vector.shape_cast %68 : vector<1x12x1xf32> to vector<12x1xf32>
    %70 = vector.broadcast %69 : vector<12x1xf32> to vector<12x256xf32>
    %71 = arith.mulf %67, %70 : vector<12x256xf32>
    %72 = arith.addf %63, %71 : vector<12x256xf32>
    %c239_i32 = arith.constant 239 : i32
    %73 = tpu.dynamic_rotate %5 by %c239_i32 dim 1 : vector<12x256xf32>, i32 -> vector<12x256xf32>
    %c8 = arith.constant 8 : index
    %c0_36 = arith.constant 0 : index
    %74 = vector.load %arg2[%c8, %c0_36] : memref<9x256xf32, #tpu.memory_space<vmem>>, vector<1x256xf32>
    %75 = vector.broadcast %74 : vector<1x256xf32> to vector<12x256xf32>
    %76 = arith.mulf %73, %75 : vector<12x256xf32>
    %c8_37 = arith.constant 8 : index
    %c0_38 = arith.constant 0 : index
    %c0_39 = arith.constant 0 : index
    %77 = vector.load %arg5[%c8_37, %c0_38, %c0_39] : memref<9x12x1xf32, #tpu.memory_space<vmem>>, vector<1x12x1xf32>
    %78 = vector.shape_cast %77 : vector<1x12x1xf32> to vector<12x1xf32>
    %79 = vector.broadcast %78 : vector<12x1xf32> to vector<12x256xf32>
    %80 = arith.mulf %76, %79 : vector<12x256xf32>
    %81 = arith.addf %72, %80 : vector<12x256xf32>
    %c0_40 = arith.constant 0 : index
    %c0_41 = arith.constant 0 : index
    %82 = vector.load %arg6[%c0_40, %c0_41] : memref<12x1xf32, #tpu.memory_space<vmem>>, vector<12x1xf32>
    %83 = vector.broadcast %82 : vector<12x1xf32> to vector<12x256xf32>
    %84 = arith.addf %81, %83 : vector<12x256xf32>
    %85 = vector.extract_strided_slice %84 {offsets = [0, 0], sizes = [4, 256], strides = [1, 1]} : vector<12x256xf32> to vector<4x256xf32>
    %86 = vector.extract_strided_slice %84 {offsets = [4, 0], sizes = [4, 256], strides = [1, 1]} : vector<12x256xf32> to vector<4x256xf32>
    %87 = vector.extract_strided_slice %84 {offsets = [8, 0], sizes = [4, 256], strides = [1, 1]} : vector<12x256xf32> to vector<4x256xf32>
    %88 = arith.mulf %85, %85 : vector<4x256xf32>
    %cst_42 = arith.constant dense<0.000000e+00> : vector<4xf32>
    %89 = vector.multi_reduction <add>, %88, %cst_42 [1] : vector<4x256xf32> to vector<4xf32>
    %90 = vector.shape_cast %89 : vector<4xf32> to vector<4x1xf32>
    %cst_43 = arith.constant 1.000000e-24 : f32
    %91 = vector.broadcast %cst_43 : f32 to vector<4x1xf32>
    %92 = arith.maximumf %90, %91 : vector<4x1xf32>
    %93 = math.rsqrt %92 : vector<4x1xf32>
    %cst_44 = arith.constant 6.250000e-02 : f32
    %94 = vector.broadcast %cst_44 : f32 to vector<4x1xf32>
    %95 = arith.mulf %93, %94 : vector<4x1xf32>
    %96 = vector.broadcast %95 : vector<4x1xf32> to vector<4x256xf32>
    %97 = arith.mulf %85, %96 : vector<4x256xf32>
    %98 = arith.mulf %86, %86 : vector<4x256xf32>
    %cst_45 = arith.constant dense<0.000000e+00> : vector<4xf32>
    %99 = vector.multi_reduction <add>, %98, %cst_45 [1] : vector<4x256xf32> to vector<4xf32>
    %100 = vector.shape_cast %99 : vector<4xf32> to vector<4x1xf32>
    %cst_46 = arith.constant 1.000000e-24 : f32
    %101 = vector.broadcast %cst_46 : f32 to vector<4x1xf32>
    %102 = arith.maximumf %100, %101 : vector<4x1xf32>
    %103 = math.rsqrt %102 : vector<4x1xf32>
    %104 = vector.broadcast %103 : vector<4x1xf32> to vector<4x256xf32>
    %105 = arith.mulf %86, %104 : vector<4x256xf32>
    %106 = arith.truncf %105 : vector<4x256xf32> to vector<4x256xbf16>
    %107 = arith.truncf %97 : vector<4x256xf32> to vector<4x256xbf16>
    %cst_47 = arith.constant dense<0.000000e+00> : vector<256x256xf32>
    %108 = tpu.matmul %106, %107, %cst_47 {dimension_numbers = #tpu.dot_dimension_numbers<[0], [0], [1], [1], [0, 1, 1, 1], [], []>} : vector<4x256xbf16>, vector<4x256xbf16>, vector<256x256xf32> -> vector<256x256xf32>
    %109 = arith.truncf %108 : vector<256x256xf32> to vector<256x256xbf16>
    %110 = math.exp %109 : vector<256x256xbf16>
    %111 = arith.extf %110 : vector<256x256xbf16> to vector<256x256xf32>
    %cst_48 = arith.constant dense<0.000000e+00> : vector<256xf32>
    %112 = vector.multi_reduction <add>, %111, %cst_48 [0] : vector<256x256xf32> to vector<256xf32>
    %113 = vector.shape_cast %112 : vector<256xf32> to vector<1x256xf32>
    %114 = tpu.reciprocal %113 {approx = true} : vector<1x256xf32> -> vector<1x256xf32>
    %115 = vector.broadcast %114 : vector<1x256xf32> to vector<4x256xf32>
    %116 = arith.mulf %87, %115 : vector<4x256xf32>
    %117 = arith.truncf %116 : vector<4x256xf32> to vector<4x256xbf16>
    %cst_49 = arith.constant dense<0.000000e+00> : vector<4x256xf32>
    %118 = tpu.matmul %117, %110, %cst_49 {dimension_numbers = #tpu.dot_dimension_numbers<[1], [1], [0], [0], [0, 0, 1, 0], [], []>} : vector<4x256xbf16>, vector<256x256xbf16>, vector<4x256xf32> -> vector<4x256xf32>
    %c17_i32_50 = arith.constant 17 : i32
    %119 = tpu.dynamic_rotate %118 by %c17_i32_50 dim 1 : vector<4x256xf32>, i32 -> vector<4x256xf32>
    %c0_51 = arith.constant 0 : index
    %c0_52 = arith.constant 0 : index
    %120 = vector.load %arg2[%c0_51, %c0_52] : memref<9x256xf32, #tpu.memory_space<vmem>>, vector<1x256xf32>
    %121 = vector.broadcast %120 : vector<1x256xf32> to vector<4x256xf32>
    %122 = arith.mulf %119, %121 : vector<4x256xf32>
    %c0_53 = arith.constant 0 : index
    %c0_54 = arith.constant 0 : index
    %123 = vector.load %arg10[%c0_53, %c0_54] : memref<36x256xf32, #tpu.memory_space<vmem>>, vector<4x256xf32>
    tpu.vector_store %arg10[%c0_53, %c0_54], %122 {strides = array<i32>} : memref<36x256xf32, #tpu.memory_space<vmem>>, vector<4x256xf32>,
    %c16_i32_55 = arith.constant 16 : i32
    %124 = tpu.dynamic_rotate %118 by %c16_i32_55 dim 1 : vector<4x256xf32>, i32 -> vector<4x256xf32>
    %c1_56 = arith.constant 1 : index
    %c0_57 = arith.constant 0 : index
    %125 = vector.load %arg2[%c1_56, %c0_57] : memref<9x256xf32, #tpu.memory_space<vmem>>, vector<1x256xf32>
    %126 = vector.broadcast %125 : vector<1x256xf32> to vector<4x256xf32>
    %127 = arith.mulf %124, %126 : vector<4x256xf32>
    %c4_58 = arith.constant 4 : index
    %c0_59 = arith.constant 0 : index
    %128 = vector.load %arg10[%c4_58, %c0_59] : memref<36x256xf32, #tpu.memory_space<vmem>>, vector<4x256xf32>
    tpu.vector_store %arg10[%c4_58, %c0_59], %127 {strides = array<i32>} : memref<36x256xf32, #tpu.memory_space<vmem>>, vector<4x256xf32>,
    %c15_i32_60 = arith.constant 15 : i32
    %129 = tpu.dynamic_rotate %118 by %c15_i32_60 dim 1 : vector<4x256xf32>, i32 -> vector<4x256xf32>
    %c2_61 = arith.constant 2 : index
    %c0_62 = arith.constant 0 : index
    %130 = vector.load %arg2[%c2_61, %c0_62] : memref<9x256xf32, #tpu.memory_space<vmem>>, vector<1x256xf32>
    %131 = vector.broadcast %130 : vector<1x256xf32> to vector<4x256xf32>
    %132 = arith.mulf %129, %131 : vector<4x256xf32>
    %c8_63 = arith.constant 8 : index
    %c0_64 = arith.constant 0 : index
    %133 = vector.load %arg10[%c8_63, %c0_64] : memref<36x256xf32, #tpu.memory_space<vmem>>, vector<4x256xf32>
    tpu.vector_store %arg10[%c8_63, %c0_64], %132 {strides = array<i32>} : memref<36x256xf32, #tpu.memory_space<vmem>>, vector<4x256xf32>,
    %c1_i32_65 = arith.constant 1 : i32
    %134 = tpu.dynamic_rotate %118 by %c1_i32_65 dim 1 : vector<4x256xf32>, i32 -> vector<4x256xf32>
    %c3_66 = arith.constant 3 : index
    %c0_67 = arith.constant 0 : index
    %135 = vector.load %arg2[%c3_66, %c0_67] : memref<9x256xf32, #tpu.memory_space<vmem>>, vector<1x256xf32>
    %136 = vector.broadcast %135 : vector<1x256xf32> to vector<4x256xf32>
    %137 = arith.mulf %134, %136 : vector<4x256xf32>
    %c12 = arith.constant 12 : index
    %c0_68 = arith.constant 0 : index
    %138 = vector.load %arg10[%c12, %c0_68] : memref<36x256xf32, #tpu.memory_space<vmem>>, vector<4x256xf32>
    tpu.vector_store %arg10[%c12, %c0_68], %137 {strides = array<i32>} : memref<36x256xf32, #tpu.memory_space<vmem>>, vector<4x256xf32>,
    %c16 = arith.constant 16 : index
    %c0_69 = arith.constant 0 : index
    %139 = vector.load %arg10[%c16, %c0_69] : memref<36x256xf32, #tpu.memory_space<vmem>>, vector<4x256xf32>
    tpu.vector_store %arg10[%c16, %c0_69], %118 {strides = array<i32>} : memref<36x256xf32, #tpu.memory_space<vmem>>, vector<4x256xf32>,
    %c255_i32_70 = arith.constant 255 : i32
    %140 = tpu.dynamic_rotate %118 by %c255_i32_70 dim 1 : vector<4x256xf32>, i32 -> vector<4x256xf32>
    %c5_71 = arith.constant 5 : index
    %c0_72 = arith.constant 0 : index
    %141 = vector.load %arg2[%c5_71, %c0_72] : memref<9x256xf32, #tpu.memory_space<vmem>>, vector<1x256xf32>
    %142 = vector.broadcast %141 : vector<1x256xf32> to vector<4x256xf32>
    %143 = arith.mulf %140, %142 : vector<4x256xf32>
    %c20 = arith.constant 20 : index
    %c0_73 = arith.constant 0 : index
    %144 = vector.load %arg10[%c20, %c0_73] : memref<36x256xf32, #tpu.memory_space<vmem>>, vector<4x256xf32>
    tpu.vector_store %arg10[%c20, %c0_73], %143 {strides = array<i32>} : memref<36x256xf32, #tpu.memory_space<vmem>>, vector<4x256xf32>,
    %c241_i32_74 = arith.constant 241 : i32
    %145 = tpu.dynamic_rotate %118 by %c241_i32_74 dim 1 : vector<4x256xf32>, i32 -> vector<4x256xf32>
    %c6_75 = arith.constant 6 : index
    %c0_76 = arith.constant 0 : index
    %146 = vector.load %arg2[%c6_75, %c0_76] : memref<9x256xf32, #tpu.memory_space<vmem>>, vector<1x256xf32>
    %147 = vector.broadcast %146 : vector<1x256xf32> to vector<4x256xf32>
    %148 = arith.mulf %145, %147 : vector<4x256xf32>
    %c24 = arith.constant 24 : index
    %c0_77 = arith.constant 0 : index
    %149 = vector.load %arg10[%c24, %c0_77] : memref<36x256xf32, #tpu.memory_space<vmem>>, vector<4x256xf32>
    tpu.vector_store %arg10[%c24, %c0_77], %148 {strides = array<i32>} : memref<36x256xf32, #tpu.memory_space<vmem>>, vector<4x256xf32>,
    %c240_i32_78 = arith.constant 240 : i32
    %150 = tpu.dynamic_rotate %118 by %c240_i32_78 dim 1 : vector<4x256xf32>, i32 -> vector<4x256xf32>
    %c7_79 = arith.constant 7 : index
    %c0_80 = arith.constant 0 : index
    %151 = vector.load %arg2[%c7_79, %c0_80] : memref<9x256xf32, #tpu.memory_space<vmem>>, vector<1x256xf32>
    %152 = vector.broadcast %151 : vector<1x256xf32> to vector<4x256xf32>
    %153 = arith.mulf %150, %152 : vector<4x256xf32>
    %c28 = arith.constant 28 : index
    %c0_81 = arith.constant 0 : index
    %154 = vector.load %arg10[%c28, %c0_81] : memref<36x256xf32, #tpu.memory_space<vmem>>, vector<4x256xf32>
    tpu.vector_store %arg10[%c28, %c0_81], %153 {strides = array<i32>} : memref<36x256xf32, #tpu.memory_space<vmem>>, vector<4x256xf32>,
    %c239_i32_82 = arith.constant 239 : i32
    %155 = tpu.dynamic_rotate %118 by %c239_i32_82 dim 1 : vector<4x256xf32>, i32 -> vector<4x256xf32>
    %c8_83 = arith.constant 8 : index
    %c0_84 = arith.constant 0 : index
    %156 = vector.load %arg2[%c8_83, %c0_84] : memref<9x256xf32, #tpu.memory_space<vmem>>, vector<1x256xf32>
    %157 = vector.broadcast %156 : vector<1x256xf32> to vector<4x256xf32>
    %158 = arith.mulf %155, %157 : vector<4x256xf32>
    %c32 = arith.constant 32 : index
    %c0_85 = arith.constant 0 : index
    %159 = vector.load %arg10[%c32, %c0_85] : memref<36x256xf32, #tpu.memory_space<vmem>>, vector<4x256xf32>
    tpu.vector_store %arg10[%c32, %c0_85], %158 {strides = array<i32>} : memref<36x256xf32, #tpu.memory_space<vmem>>, vector<4x256xf32>,
    %c0_86 = arith.constant 0 : index
    %c0_87 = arith.constant 0 : index
    %160 = vector.load %arg7[%c0_86, %c0_87] : memref<4x36xf32, #tpu.memory_space<vmem>>, vector<4x36xf32>
    %c0_88 = arith.constant 0 : index
    %c0_89 = arith.constant 0 : index
    %161 = vector.load %arg10[%c0_88, %c0_89] : memref<36x256xf32, #tpu.memory_space<vmem>>, vector<36x256xf32>
    %cst_90 = arith.constant dense<0.000000e+00> : vector<4x256xf32>
    %162 = tpu.matmul %160, %161, %cst_90 {dimension_numbers = #tpu.dot_dimension_numbers<[1], [0], [0], [1], [0, 0, 1, 1], [], []>} : vector<4x36xf32>, vector<36x256xf32>, vector<4x256xf32> -> vector<4x256xf32>
    %c0_91 = arith.constant 0 : index
    %c0_92 = arith.constant 0 : index
    %163 = vector.load %arg8[%c0_91, %c0_92] : memref<4x1xf32, #tpu.memory_space<vmem>>, vector<4x1xf32>
    %164 = vector.broadcast %163 : vector<4x1xf32> to vector<4x256xf32>
    %165 = arith.addf %162, %164 : vector<4x256xf32>
    %c0_93 = arith.constant 0 : index
    %c0_94 = arith.constant 0 : index
    %166 = vector.load %arg9[%c0_93, %c0_94] : memref<4x256xf32, #tpu.memory_space<vmem>>, vector<4x256xf32>
    tpu.vector_store %arg9[%c0_93, %c0_94], %165 {strides = array<i32>} : memref<4x256xf32, #tpu.memory_space<vmem>>, vector<4x256xf32>,
    return
  }
  func.func @transform_0(%arg0: i32) -> (i32, i32) {
    %c0_i32 = arith.constant 0 : i32
    %c0_i32_0 = arith.constant 0 : i32
    return %c0_i32, %arg0 : i32, i32
  }
  func.func @transform_1(%arg0: i32) -> (i32, i32) {
    %c0_i32 = arith.constant 0 : i32
    %c0_i32_0 = arith.constant 0 : i32
    %c0_i32_1 = arith.constant 0 : i32
    return %c0_i32, %c0_i32_0 : i32, i32
  }
  func.func @transform_2(%arg0: i32) -> (i32, i32) {
    %c0_i32 = arith.constant 0 : i32
    %c0_i32_0 = arith.constant 0 : i32
    %c0_i32_1 = arith.constant 0 : i32
    return %c0_i32, %c0_i32_0 : i32, i32
  }
  func.func @transform_3(%arg0: i32) -> (i32, i32) {
    %c0_i32 = arith.constant 0 : i32
    %c0_i32_0 = arith.constant 0 : i32
    %c0_i32_1 = arith.constant 0 : i32
    return %c0_i32, %c0_i32_0 : i32, i32
  }
  func.func @transform_4(%arg0: i32) -> (i32, i32, i32) {
    %c0_i32 = arith.constant 0 : i32
    %c0_i32_0 = arith.constant 0 : i32
    %c0_i32_1 = arith.constant 0 : i32
    %c0_i32_2 = arith.constant 0 : i32
    return %c0_i32, %c0_i32_0, %c0_i32_1 : i32, i32, i32
  }
  func.func @transform_5(%arg0: i32) -> (i32, i32) {
    %c0_i32 = arith.constant 0 : i32
    %c0_i32_0 = arith.constant 0 : i32
    %c0_i32_1 = arith.constant 0 : i32
    return %c0_i32, %c0_i32_0 : i32, i32
  }
  func.func @transform_6(%arg0: i32) -> (i32, i32) {
    %c0_i32 = arith.constant 0 : i32
    %c0_i32_0 = arith.constant 0 : i32
    %c0_i32_1 = arith.constant 0 : i32
    return %c0_i32, %c0_i32_0 : i32, i32
  }
  func.func @transform_7(%arg0: i32) -> (i32, i32) {
    %c0_i32 = arith.constant 0 : i32
    %c0_i32_0 = arith.constant 0 : i32
    %c0_i32_1 = arith.constant 0 : i32
    return %c0_i32, %c0_i32_0 : i32, i32
  }
  func.func @transform_8(%arg0: i32) -> (i32, i32) {
    %c0_i32 = arith.constant 0 : i32
    %c0_i32_0 = arith.constant 0 : i32
    return %c0_i32, %arg0 : i32, i32
  }
}

</mosaic_0001>

<bundles_post_ra>
// kernel: pixelwise_self_attention.1
= control target key start
LH: loop header
LB: loop body
LE: loop exit
PB: predicated region body
PF: predicated region fallthrough
CT: control target
= control target key end

     0   :  { %s2052_s27 = smov 0   ;;  %s2765_s0 = inlined_call_operand.vmem [shape: f32[4,512], index: 0, kind: input, shape index: {}]   ;;  %s2766_s1 = inlined_call_operand.vmem [shape: f32[9,256], index: 1, kind: input, shape index: {}]   ;;  %s2767_s2 = inlined_call_operand.vmem [shape: f32[12,4], index: 2, kind: input, shape index: {}]   ;;  %s2768_s3 = inlined_call_operand.vmem [shape: f32[12,1], index: 3, kind: input, shape index: {}]   ;;  %s2769_s4 = inlined_call_operand.vmem [shape: f32[9,12,1], index: 4, kind: input, shape index: {}]   ;;  %s2770_s5 = inlined_call_operand.vmem [shape: f32[12,1], index: 5, kind: input, shape index: {}]   ;;  %s2771_s6 = inlined_call_operand.vmem [shape: f32[4,36], index: 6, kind: input, shape index: {}]   ;;  %s2772_s7 = inlined_call_operand.vmem [shape: f32[4,1], index: 7, kind: input, shape index: {}]   ;;  %s2773_s8 = inlined_call_operand.vmem [shape: f32[4,512], index: 8, kind: output, shape index: {}]  }
   0x1 LB: > { %s1831_s28 = sadd.s32 4294967295, %s1995_s27   ;;  %p1835_p0 = scmp.ge.s32.totalorder %s1995_s27, 1  ;;  %s1995_s27 = sphi %s2052_s27, %s18_s27  }
   0x2   : > { %p263_p1 = scmp.lt.s32.totalorder %s1995_s27, 3 }
   0x4   : > { %p264_p2 = pnand %p1835_p0, %p263_p1 }
   0x6   : > { %267 = sbr.rel (%p264_p2) target bundleno = 1592 (0x638), region = 52 }
   0xb   : > { %s1836_s29 = sshll.u32 %s1831_s28, 1  ;;  %v1997_v0 = vmov 0.0   ;;  %v1998_v1 = vmov 0   ;;  %v313_v2 = vld [vmem:[%s2768_s3] sm:$0xff]  ;;  %v1847_v5 = vld [vmem:[%s2769_s4 + $0x10] sm:$0xff]  ;;  %vm334_vm0 = vcmask 1043456   ;;  %v441_v33 = vlaneseq }
   0xc   : > { %p298_p3 = scmp.lt.s32.totalorder %s1836_s29, 3  ;;  %403 = vmatprep.mubr.f32.mxu0 %v1997_v0  ;;  %1914 = vset.pattern.permute.xlu0 %v1998_v1  ;;  %v464_v3 = vld [vmem:[%s2769_s4] sm:$0xff]  ;;  %v1853_v9 = vld [vmem:[%s2769_s4 + $0x30] sm:$0xff]  ;;  %vm327_vm1 = vcmask 31744   ;;  %s1999_s14 = smov 16   ;;  %vm869_vm10 = vcmask 1047556  }
   0xd   : > { %317 = vperm.xlu0 %1914, %v313_v2   ;;  %1915 = vset.pattern.permute.xlu1 %v1998_v1  ;;  %v1844_v4 = vld [vmem:[%s2769_s4 + $0x40] sm:$0xff]  ;;  %v1856_v11 = vld [vmem:[%s2769_s4 + $0x50] sm:$0xff]  ;;  %s2000_s15 = smov 17   ;;  %s2001_s17 = smov 1   ;;  %v312_v21 = vld [vmem:[%s2767_s2 + $0x8] sm:$0xf] }
   0xe   : > { %s2810_s29 = smov (!%p298_p3, %s1836_s29), 3  ;;  %468 = vperm.xlu1 %1915, %v464_v3   ;;  %1008 = vmatprep.mubr.bf16.mxu1 %v1998_v1  ;;  %v1850_v7 = vld [vmem:[%s2769_s4 + $0x20] sm:$0xff]  ;;  %v1862_v13 = vld [vmem:[%s2769_s4 + $0x70] sm:$0xff]  ;;  %s2002_s18 = smov 15   ;;  %v451_v36 = vshrl.u32 %v441_v33, 7  ;;  %v2148_v39 = vand.u32 127, %v441_v33 }
   0xf   : > { %s1837_s16 = sshll.u32 %s2810_s29, 2  ;;  %v311_v10 = vld [vmem:[%s2767_s2] sm:$0xff]  ;;  %s2004_s20 = smov 127   ;;  %vm969_vm11 = vcmask 1041408   ;;  %vm1689_vm12 = vcmask 293888  }
  0x10   : > { %s301_s19 = scalar_lea.vmem %s2765_s0, %s1837_s16  ;;  %v1859_v12 = vld [vmem:[%s2769_s4 + $0x60] sm:$0xff]  ;;  %s2005_s21 = smov 111   ;;  %v2150_v40 = vsub.s32 0, %v451_v36  ;;  %v2152_v41 = vsub.s32 1, %v451_v36  ;;  %vm443_vm2 = vcmp.lt.s32.totalorder %v2148_v39, 17  ;;  %vm492_vm3 = vcmp.lt.s32.totalorder %v2148_v39, 16 }
  0x11   : > { %421 = vperm.xlu0 %1914, %v1844_v4   ;;  %v310_v6 = vld [vmem:[%s301_s19] sm:$0xff]  ;;  %s2003_s19 = smov 113   ;;  %s2006_s22 = smov 112   ;;  %vm543_vm4 = vcmp.lt.s32.totalorder %v2148_v39, 15  ;;  %vm594_vm5 = vcmp.lt.s32.totalorder %v2148_v39, 1  ;;  %vm645_vm6 = vcmp.lt.s32.totalorder %v2148_v39, 127 }
  0x12   : > { %519 = vperm.xlu1 %1915, %v1847_v5   ;;  %v326_v8 = vcombine.high %v310_v6, %v310_v6  ;;  %v1865_v14 = vld [vmem:[%s2769_s4 + $0x80] sm:$0xff]  ;;  %2787 = vst [vmem:[#allocation3_spill] sm:$0xff] %v2150_v40  ;;  %2788 = vst [vmem:[#allocation4_spill] sm:$0xff] %v2152_v41  ;;  %vm696_vm7 = vcmp.lt.s32.totalorder %v2148_v39, 113  ;;  %vm747_vm8 = vcmp.lt.s32.totalorder %v2148_v39, 112  ;;  %vm798_vm9 = vcmp.lt.s32.totalorder %v2148_v39, 111 }
  0x13   : > { %v841_v20 = vld [vmem:[%s2770_s5] sm:$0xff] }
  0x14   : > { %1840 = vmatprep.subr.msk.mxu0 %vm334_vm0, %v326_v8  ;;  %v448_v42 = vld [vmem:[%s2766_s1] ss:$8 sm:$0x3]  ;;  %v1846_v43 = vld [vmem:[%s2766_s1 + $0x1] ss:$8 sm:$0x3] }
  0x15   : > { %570 = vperm.xlu0 %1914, %v1850_v7   ;;  %1841 = vmatpush1.msk.msra.mxu0 %vm334_vm0, %v310_v6  ;;  %v1849_v44 = vld [vmem:[%s2766_s1 + $0x2] ss:$8 sm:$0x3]  ;;  %v1852_v48 = vld [vmem:[%s2766_s1 + $0x3] ss:$8 sm:$0x3]  ;;  %v2172_v50 = vrot.slane %v448_v42, %v2150_v40  ;;  %v2175_v51 = vrot.slane %v448_v42, %v2152_v41  ;;  %v2182_v53 = vrot.slane %v1846_v43, %v2150_v40 }
  0x16   : > { %621 = vperm.xlu1 %1915, %v1853_v9   ;;  %1842 = vmatmul.mubr.msk.f32.vlgmr.msra.gmra.mxu0 %vm327_vm1, %v311_v10  ;;  %v1855_v52 = vld [vmem:[%s2766_s1 + $0x5] ss:$8 sm:$0x3]  ;;  %v2185_v54 = vrot.slane %v1846_v43, %v2152_v41  ;;  %v2189_v55 = vrot.slane %v1849_v44, %v2150_v40  ;;  %v2192_v56 = vrot.slane %v1849_v44, %v2152_v41  ;;  %v1858_v59 = vld [vmem:[%s2766_s1 + $0x6] ss:$8 sm:$0x3] }
  0x17   : > { %409 = vmatprep.mubr.f32.mxu0 %v1997_v0  ;;  %2789 = vst [vmem:[#allocation5_spill] sm:$0xff] %v2172_v50  ;;  %2790 = vst [vmem:[#allocation6_spill] sm:$0xff] %v2175_v51  ;;  %v2196_v57 = vrot.slane %v1852_v48, %v2150_v40  ;;  %v2199_v58 = vrot.slane %v1852_v48, %v2152_v41  ;;  %v2206_v62 = vrot.slane %v1855_v52, %v2150_v40  ;;  %v1861_v2 = vld [vmem:[%s2766_s1 + $0x7] ss:$8 sm:$0x3] }
  0x18   : > { %v2209_v63 = vrot.slane %v1855_v52, %v2152_v41  ;;  %v2250_v43 = vrot.slane %v1861_v2, %v2152_v41  ;;  %v1864_v52 = vld [vmem:[%s2766_s1 + $0x10] ss:$8 sm:$0x3] }
  0x19   : > { %672 = vperm.xlu0 %1914, %v1856_v11   ;;  %v2228_v11 = vrot.slane %v1858_v59, %v2150_v40 }
  0x1a   : > { %723 = vperm.xlu1 %1915, %v1859_v12   ;;  %1843 = vmatmul.mubr.msk.f32.gmra.mxu0 %vm327_vm1, %v312_v21  ;;  %v2231_v12 = vrot.slane %v1858_v59, %v2152_v41 }
  0x1d   : > { %774 = vperm.xlu0 %1914, %v1862_v13   ;;  %v2235_v13 = vrot.slane %v1861_v2, %v2150_v40 }
  0x1e   : > { %825 = vperm.xlu1 %1915, %v1865_v14  }
  0x88   : > { %v318_v15 = vpop.permute.xlu0 %317 }
  0x89   : > { %v469_v22 = vpop.permute.xlu1 %468 }
  0x8c   : > { %v422_v23 = vpop.permute.xlu0 %421 }
  0x8d   : > { %v520_v24 = vpop.permute.xlu1 %519 }
  0x90   : > { %v2132_v25 = vpop.permute.xlu0 %570 }
  0x91   : > { %v2134_v26 = vpop.permute.xlu1 %621 }
  0x94   : > { %v2136_v27 = vpop.permute.xlu0 %672 }
  0x95   : > { %v2138_v28 = vpop.permute.xlu1 %723 }
  0x98   : > { %v2140_v29 = vpop.permute.xlu0 %774 }
  0x99   : > { %v2142_v30 = vpop.permute.xlu1 %825 }
  0xd6   : > { %v405_v16 = vpop.f32.mrf.mxu0 }
  0xd7   : > { %v406_v17 = vadd.f32 %v405_v16, %v318_v15 }
  0xd8   : > { %v407_v18 = vpop.f32.mrf.mxu0 }
  0xd9   : > { %484 = vrot.lane.b32.xlu0 %v406_v17, %s1999_s14  ;;  %433 = vrot.lane.b32.xlu1 %v406_v17, %s2000_s15  ;;  %v408_v19 = vadd.f32 %v407_v18, %v318_v15  ;;  %v429_v47 = vmul.f32 %v422_v23, %v406_v17 }
  0xdb   : > { %v430_v49 = vmul.f32 %v422_v23, %v408_v19 }
  0xdd   : > { %586 = vrot.lane.b32.xlu0 %v406_v17, %s2001_s17  ;;  %535 = vrot.lane.b32.xlu1 %v406_v17, %s2002_s18 }
  0xe1   : > { %688 = vrot.lane.b32.xlu0 %v406_v17, %s2003_s19  ;;  %637 = vrot.lane.b32.xlu1 %v406_v17, %s2004_s20 }
  0xe5   : > { %790 = vrot.lane.b32.xlu0 %v406_v17, %s2005_s21  ;;  %739 = vrot.lane.b32.xlu1 %v406_v17, %s2006_s22 }
  0xe9   : > { %437 = vrot.lane.b32.xlu0 %v408_v19, %s2000_s15  ;;  %488 = vrot.lane.b32.xlu1 %v408_v19, %s1999_s14 }
  0xed   : > { %539 = vrot.lane.b32.xlu0 %v408_v19, %s2002_s18  ;;  %590 = vrot.lane.b32.xlu1 %v408_v19, %s2001_s17 }
  0xf1   : > { %641 = vrot.lane.b32.xlu0 %v408_v19, %s2004_s20  ;;  %692 = vrot.lane.b32.xlu1 %v408_v19, %s2003_s19 }
  0xf5   : > { %743 = vrot.lane.b32.xlu0 %v408_v19, %s2006_s22  ;;  %794 = vrot.lane.b32.xlu1 %v408_v19, %s2005_s21 }
  0xf9   : > { %845 = vperm.xlu0 %1914, %v841_v20  }
 0x14b   : > { %v485_v31 = vpop.permute.xlu0 %484  ;;  %v434_v32 = vpop.permute.xlu1 %433 }
 0x14f   : > { %v587_v34 = vpop.permute.xlu0 %586  ;;  %v536_v35 = vpop.permute.xlu1 %535 }
 0x153   : > { %v2144_v37 = vpop.permute.xlu0 %688  ;;  %v2146_v38 = vpop.permute.xlu1 %637 }
 0x157   : > { %v2163_v45 = vpop.permute.xlu0 %790  ;;  %v2165_v46 = vpop.permute.xlu1 %739 }
 0x15b   : > { %v438_v60 = vpop.permute.xlu0 %437  ;;  %v489_v61 = vpop.permute.xlu1 %488 }
 0x15c   : > { %v444_v3 = vsel %vm443_vm2, %v434_v32, %v438_v60  ;;  %v446_v4 = vsel %vm443_vm2, %v438_v60, %v434_v32  ;;  %v493_v5 = vsel %vm492_vm3, %v485_v31, %v489_v61  ;;  %v495_v6 = vsel %vm492_vm3, %v489_v61, %v485_v31 }
 0x15d   : > { %v460_v7 = vmul.f32 %v2172_v50, %v446_v4  ;;  %v461_v8 = vmul.f32 %v2175_v51, %v444_v3  ;;  %v510_v9 = vmul.f32 %v2182_v53, %v495_v6  ;;  %v511_v10 = vmul.f32 %v2185_v54, %v493_v5 }
 0x15f   : > { %v476_v14 = vmul.f32 %v469_v22, %v460_v7  ;;  %v477_v15 = vmul.f32 %v469_v22, %v461_v8  ;;  %v527_v16 = vmul.f32 %v520_v24, %v510_v9  ;;  %v528_v17 = vmul.f32 %v520_v24, %v511_v10  ;;  %v540_v18 = vpop.permute.xlu0 %539  ;;  %v591_v19 = vpop.permute.xlu1 %590 }
 0x160   : > { %v544_v20 = vsel %vm543_vm4, %v536_v35, %v540_v18  ;;  %v546_v21 = vsel %vm543_vm4, %v540_v18, %v536_v35  ;;  %v595_v23 = vsel %vm594_vm5, %v587_v34, %v591_v19  ;;  %v597_v31 = vsel %vm594_vm5, %v591_v19, %v587_v34 }
 0x161   : > { %v480_v32 = vadd.f32 %v476_v14, %v429_v47  ;;  %v481_v33 = vadd.f32 %v477_v15, %v430_v49  ;;  %v561_v22 = vmul.f32 %v2189_v55, %v546_v21  ;;  %v562_v24 = vmul.f32 %v2192_v56, %v544_v20 }
 0x162   : > { %v612_v36 = vmul.f32 %v2196_v57, %v597_v31  ;;  %v613_v42 = vmul.f32 %v2199_v58, %v595_v23  ;;  %v2275_v7 = vrot.slane %v1864_v52, %v2150_v40  ;;  %v2278_v8 = vrot.slane %v1864_v52, %v2152_v41 }
 0x163   : > { %v531_v35 = vadd.f32 %v527_v16, %v480_v32  ;;  %v532_v44 = vadd.f32 %v528_v17, %v481_v33  ;;  %v578_v48 = vmul.f32 %v2132_v25, %v561_v22  ;;  %v579_v34 = vmul.f32 %v2132_v25, %v562_v24  ;;  %v642_v47 = vpop.permute.xlu0 %641  ;;  %v693_v49 = vpop.permute.xlu1 %692 }
 0x164   : > { %v629_v59 = vmul.f32 %v2134_v26, %v612_v36  ;;  %v630_v60 = vmul.f32 %v2134_v26, %v613_v42  ;;  %v646_v61 = vsel %vm645_vm6, %v2146_v38, %v642_v47  ;;  %v648_v2 = vsel %vm645_vm6, %v642_v47, %v2146_v38 }
 0x165   : > { %v582_v3 = vadd.f32 %v578_v48, %v531_v35  ;;  %v583_v25 = vadd.f32 %v579_v34, %v532_v44  ;;  %v663_v4 = vmul.f32 %v2206_v62, %v646_v61  ;;  %v664_v5 = vmul.f32 %v2209_v63, %v648_v2 }
 0x166   : > { %v697_v6 = vsel %vm696_vm7, %v2144_v37, %v693_v49  ;;  %v699_v26 = vsel %vm696_vm7, %v693_v49, %v2144_v37 }
 0x167   : > { %v633_v38 = vadd.f32 %v629_v59, %v582_v3  ;;  %v634_v9 = vadd.f32 %v630_v60, %v583_v25  ;;  %v680_v10 = vmul.f32 %v2136_v27, %v663_v4  ;;  %v681_v14 = vmul.f32 %v2136_v27, %v664_v5  ;;  %v744_v15 = vpop.permute.xlu0 %743  ;;  %v795_v16 = vpop.permute.xlu1 %794 }
 0x168   : > { %v714_v17 = vmul.f32 %v2228_v11, %v697_v6  ;;  %v715_v18 = vmul.f32 %v2231_v12, %v699_v26  ;;  %v748_v37 = vsel %vm747_vm8, %v2165_v46, %v744_v15  ;;  %v750_v19 = vsel %vm747_vm8, %v744_v15, %v2165_v46 }
 0x169   : > { %v684_v20 = vadd.f32 %v680_v10, %v633_v38  ;;  %v685_v21 = vadd.f32 %v681_v14, %v634_v9  ;;  %v765_v23 = vmul.f32 %v2235_v13, %v748_v37  ;;  %v766_v27 = vmul.f32 %v2250_v43, %v750_v19 }
 0x16a   : > { %v731_v31 = vmul.f32 %v2138_v28, %v714_v17  ;;  %v732_v32 = vmul.f32 %v2138_v28, %v715_v18  ;;  %v799_v33 = vsel %vm798_vm9, %v2163_v45, %v795_v16  ;;  %v801_v22 = vsel %vm798_vm9, %v795_v16, %v2163_v45 }
 0x16b   : > { %v782_v46 = vmul.f32 %v2140_v29, %v765_v23  ;;  %v783_v24 = vmul.f32 %v2140_v29, %v766_v27  ;;  %v816_v35 = vmul.f32 %v2275_v7, %v799_v33  ;;  %v817_v44 = vmul.f32 %v2278_v8, %v801_v22  ;;  %v1845_v33 = vld [vmem:[%s2769_s4 + $0x48] sm:$0xf] }
 0x16c   : > { %v735_v36 = vadd.f32 %v731_v31, %v684_v20  ;;  %v736_v42 = vadd.f32 %v732_v32, %v685_v21  ;;  %v465_v22 = vld [vmem:[%s2769_s4 + $0x8] sm:$0xf] }
 0x16d   : > { %v833_v34 = vmul.f32 %v2142_v30, %v816_v35  ;;  %v834_v47 = vmul.f32 %v2142_v30, %v817_v44 }
 0x16e   : > { %v786_v48 = vadd.f32 %v782_v46, %v735_v36  ;;  %v787_v28 = vadd.f32 %v783_v24, %v736_v42  ;;  %v314_v46 = vld [vmem:[%s2768_s3 + $0x8] sm:$0xf] }
 0x170   : > { %v837_v49 = vadd.f32 %v833_v34, %v786_v48  ;;  %v838_v52 = vadd.f32 %v834_v47, %v787_v28 }
 0x174   : > { %v846_v59 = vpop.permute.xlu0 %845 }
 0x175   : > { %v853_v45 = vadd.f32 %v846_v59, %v837_v49  ;;  %v854_v60 = vadd.f32 %v846_v59, %v838_v52 }
 0x177   : > { %v857_v61 = vmul.f32 %v853_v45, %v853_v45  ;;  %v858_v29 = vmul.f32 %v854_v60, %v854_v60 }
 0x179   : > { %v870_v2 = vsel %vm869_vm10, %v857_v61, 0.0  ;;  %v871_v3 = vsel %vm869_vm10, %v858_v29, 0.0  ;;  %v859_v25 = vsel %vm334_vm0, %v857_v61, 0.0  ;;  %v860_v4 = vsel %vm334_vm0, %v858_v29, 0.0  ;;  %v411_v29 = vpop.f32.mrf.mxu0 }
 0x17a   : > { %v872_v5 = vadd.f32 %v871_v3, %v870_v2  ;;  %v861_v6 = vadd.f32 %v860_v4, %v859_v25 }
 0x17b   : > { %v413_v3 = vpop.f32.mrf.mxu0 }
 0x17c   : > { %873 = vadd.xlane.f32.xlu1 %v872_v5  ;;  %862 = vadd.xlane.f32.xlu0 %v861_v6 }
 0x205   : > { %v874_v26 = vpop.xlane.xlu1 %873  ;;  %v863_v30 = vpop.xlane.xlu0 %862 }
 0x206   : > { %v875_v38 = vmax.f32 %v874_v26, 1e-24  ;;  %v864_v9 = vmax.f32 %v863_v30, 1e-24  ;;  %v1848_v30 = vld [vmem:[%s2769_s4 + $0x18] sm:$0xf] }
 0x208   : > { %1917 = vrsqrt.f32 %v875_v38  ;;  %v1851_v38 = vld [vmem:[%s2769_s4 + $0x28] sm:$0xf] }
 0x209   : > { %1919 = vrsqrt.f32 %v864_v9  ;;  %v1854_v9 = vld [vmem:[%s2769_s4 + $0x38] sm:$0xf] }
 0x215   : > { %v1918_v10 = vpop.eup %1917 }
 0x216   : > { %v1920_v14 = vpop.eup %1919  ;;  %v878_v15 = vmul.f32 %v1918_v10, %v854_v60  ;;  %v877_v16 = vmul.f32 %v1918_v10, %v853_v45  ;;  %v1857_v10 = vld [vmem:[%s2769_s4 + $0x58] sm:$0xf] }
 0x217   : > { %v866_v17 = vmul.f32 0.0625, %v1920_v14  ;;  %v1860_v14 = vld [vmem:[%s2769_s4 + $0x68] sm:$0xf] }
 0x218   : > { %v880_v18 = vpack.c.bf16 %v878_v15, %v878_v15  ;;  %v879_v37 = vpack.c.bf16 %v877_v16, %v877_v16  ;;  %v1863_v15 = vld [vmem:[%s2769_s4 + $0x78] sm:$0xf]  ;;  %v1866_v16 = vld [vmem:[%s2769_s4 + $0x88] sm:$0xf] }
 0x219   : > { %v868_v19 = vmul.f32 %v866_v17, %v854_v60  ;;  %v867_v20 = vmul.f32 %v866_v17, %v853_v45  ;;  %v842_v17 = vld [vmem:[%s2770_s5 + $0x8] sm:$0xf] }
 0x21a   : > { %v886_v21 = vrot.slane %v880_v18, 2  ;;  %v885_v23 = vrot.slane %v879_v37, 2 }
 0x21b   : > { %v882_v27 = vpack.c.bf16 %v868_v19, %v868_v19  ;;  %v881_v31 = vpack.c.bf16 %v867_v20, %v867_v20 }
 0x21c   : > { %905 = vxpose.xlu1.c.b16.start.end [1/1] (short) %v886_v21, 128  ;;  %889 = vxpose.xlu0.c.b16.start.end [1/1] (short) %v885_v23, 128 }
 0x21d   : > { %1867 = vmatprep.subr.msk.bf16.mxu1 %vm969_vm11, %v882_v27  ;;  %v971_v32 = vsel %vm969_vm11, %v881_v31, 0 }
 0x21e   : > { %991 = vmatpush1.bf16.msra.mxu1 %v971_v32 }
 0x23c   : > { %426 = vperm.xlu1 %1915, %v1845_v33  }
 0x240   : > { %473 = vperm.xlu1 %1915, %v465_v22  }
 0x241   : > { %322 = vperm.xlu0 %1914, %v314_v46  }
 0x27e   : > { %v897_v24 = vpop.trf.xlu0  ;;  %v913_v35 = vpop.trf.xlu1 }
 0x27f   : > { %1868 = vmatmul.mubr.msk.bf16.vlgmr.msra.gmra.mxu1 %vm327_vm1, %v897_v24 }
 0x280   : > { %1018 = vmatprep.mubr.bf16.mxu1 %v1998_v1 }
 0x282   : > { %v898_v36 = vpop.trf.xlu0  ;;  %v914_v48 = vpop.trf.xlu1 }
 0x286   : > { %v899_v42 = vpop.trf.xlu0  ;;  %v915_v28 = vpop.trf.xlu1 }
 0x287   : > { %1869 = vmatmul.mubr.msk.bf16.gmra.mxu1 %vm327_vm1, %v898_v36 }
 0x288   : > { %1028 = vmatprep.mubr.bf16.mxu1 %v1998_v1 }
 0x28a   : > { %v900_v44 = vpop.trf.xlu0  ;;  %v916_v47 = vpop.trf.xlu1 }
 0x28e   : > { %v901_v34 = vpop.trf.xlu0  ;;  %v917_v52 = vpop.trf.xlu1 }
 0x28f   : > { %1870 = vmatmul.mubr.msk.bf16.gmra.mxu1 %vm327_vm1, %v899_v42 }
 0x290   : > { %1038 = vmatprep.mubr.bf16.mxu1 %v1998_v1 }
 0x292   : > { %v902_v49 = vpop.trf.xlu0  ;;  %v918_v59 = vpop.trf.xlu1 }
 0x296   : > { %v903_v45 = vpop.trf.xlu0  ;;  %v919_v60 = vpop.trf.xlu1 }
 0x297   : > { %1871 = vmatmul.mubr.msk.bf16.gmra.mxu1 %vm327_vm1, %v900_v44 }
 0x298   : > { %1048 = vmatprep.mubr.bf16.mxu1 %v1998_v1 }
 0x29a   : > { %v904_v61 = vpop.trf.xlu0  ;;  %v920_v2 = vpop.trf.xlu1 }
 0x29f   : > { %1872 = vmatmul.mubr.msk.bf16.gmra.mxu1 %vm327_vm1, %v901_v34 }
 0x2a0   : > { %1058 = vmatprep.mubr.bf16.mxu1 %v1998_v1 }
 0x2a7   : > { %1873 = vmatmul.mubr.msk.bf16.gmra.mxu1 %vm327_vm1, %v902_v49 }
 0x2a8   : > { %1068 = vmatprep.mubr.bf16.mxu1 %v1998_v1 }
 0x2af   : > { %1874 = vmatmul.mubr.msk.bf16.gmra.mxu1 %vm327_vm1, %v903_v45 }
 0x2b0   : > { %1078 = vmatprep.mubr.bf16.mxu1 %v1998_v1 }
 0x2b7   : > { %1875 = vmatmul.mubr.msk.bf16.gmra.mxu1 %vm327_vm1, %v904_v61  ;;  %v2335_v6 = vpop.permute.xlu1 %426 }
 0x2b8   : > { %1088 = vmatprep.mubr.bf16.mxu1 %v1998_v1 }
 0x2bc   : > { %v323_v25 = vpop.permute.xlu0 %322 }
 0x2bd   : > { %v412_v4 = vadd.f32 %v411_v29, %v323_v25  ;;  %v2333_v5 = vadd.f32 %v413_v3, %v323_v25 }
 0x2bf   : > { %1876 = vmatmul.mubr.msk.bf16.gmra.mxu1 %vm327_vm1, %v913_v35  ;;  %439 = vrot.lane.b32.xlu1 %v2333_v5, %s2000_s15  ;;  %v2341_v26 = vmul.f32 %v2335_v6, %v412_v4 }
 0x2c0   : > { %435 = vrot.lane.b32.xlu0 %v412_v4, %s2000_s15  ;;  %1098 = vmatprep.mubr.bf16.mxu1 %v1998_v1 }
 0x2c3   : > { %486 = vrot.lane.b32.xlu1 %v412_v4, %s1999_s14 }
 0x2c4   : > { %524 = vperm.xlu0 %1914, %v1848_v30  }
 0x2c7   : > { %1877 = vmatmul.mubr.msk.bf16.gmra.mxu1 %vm327_vm1, %v914_v48  ;;  %575 = vperm.xlu1 %1915, %v1851_v38  }
 0x2c8   : > { %490 = vrot.lane.b32.xlu0 %v2333_v5, %s1999_s14  ;;  %1108 = vmatprep.mubr.bf16.mxu1 %v1998_v1 }
 0x2cb   : > { %541 = vrot.lane.b32.xlu1 %v2333_v5, %s2002_s18 }
 0x2cc   : > { %537 = vrot.lane.b32.xlu0 %v412_v4, %s2002_s18 }
 0x2cf   : > { %1878 = vmatmul.mubr.msk.bf16.gmra.mxu1 %vm327_vm1, %v915_v28  ;;  %588 = vrot.lane.b32.xlu1 %v412_v4, %s2001_s17 }
 0x2d0   : > { %626 = vperm.xlu0 %1914, %v1854_v9   ;;  %1118 = vmatprep.mubr.bf16.mxu1 %v1998_v1 }
 0x2d3   : > { %677 = vperm.xlu1 %1915, %v1857_v10  }
 0x2d4   : > { %592 = vrot.lane.b32.xlu0 %v2333_v5, %s2001_s17 }
 0x2d7   : > { %1879 = vmatmul.mubr.msk.bf16.gmra.mxu1 %vm327_vm1, %v916_v47  ;;  %643 = vrot.lane.b32.xlu1 %v2333_v5, %s2004_s20 }
 0x2d8   : > { %639 = vrot.lane.b32.xlu0 %v412_v4, %s2004_s20  ;;  %1128 = vmatprep.mubr.bf16.mxu1 %v1998_v1 }
 0x2db   : > { %690 = vrot.lane.b32.xlu1 %v412_v4, %s2003_s19 }
 0x2dc   : > { %728 = vperm.xlu0 %1914, %v1860_v14  }
 0x2df   : > { %1880 = vmatmul.mubr.msk.bf16.gmra.mxu1 %vm327_vm1, %v917_v52  ;;  %779 = vperm.xlu1 %1915, %v1863_v15  }
 0x2e0   : > { %694 = vrot.lane.b32.xlu0 %v2333_v5, %s2003_s19  ;;  %1138 = vmatprep.mubr.bf16.mxu1 %v1998_v1 }
 0x2e3   : > { %745 = vrot.lane.b32.xlu1 %v2333_v5, %s2006_s22 }
 0x2e4   : > { %741 = vrot.lane.b32.xlu0 %v412_v4, %s2006_s22 }
 0x2e7   : > { %1881 = vmatmul.mubr.msk.bf16.gmra.mxu1 %vm327_vm1, %v918_v59  ;;  %792 = vrot.lane.b32.xlu1 %v412_v4, %s2005_s21 }
 0x2e8   : > { %830 = vperm.xlu0 %1914, %v1866_v16   ;;  %1148 = vmatprep.mubr.bf16.mxu1 %v1998_v1 }
 0x2eb   : > { %850 = vperm.xlu1 %1915, %v842_v17  }
 0x2ec   : > { %796 = vrot.lane.b32.xlu0 %v2333_v5, %s2005_s21 }
 0x2ef   : > { %1882 = vmatmul.mubr.msk.bf16.gmra.mxu1 %vm327_vm1, %v919_v60 }
 0x2f0   : > { %1158 = vmatprep.mubr.bf16.mxu1 %v1998_v1 }
 0x2f7   : > { %1883 = vmatmul.mubr.msk.bf16.gmra.mxu1 %vm327_vm1, %v920_v2 }
 0x2f8   : > { %1763 = vmatprep.mubr.f32.mxu1 %v1997_v0 }
 0x33f   : > { %v1010_v18 = vpop.f32.mrf.mxu1 }
 0x341   : > { %v1012_v37 = vpop.f32.mrf.mxu1 }
 0x343   : > { %v1014_v19 = vpop.f32.mrf.mxu1 }
 0x344   : > { %v1169_v20 = vpack.c.bf16 %v1014_v19, %v1010_v18 }
 0x345   : > { %v1016_v21 = vpop.f32.mrf.mxu1 }
 0x346   : > { %v1202_v23 = vmul.bf16 1069105081, %v1169_v20  ;;  %v1170_v3 = vpack.c.bf16 %v1016_v21, %v1012_v37 }
 0x347   : > { %v1020_v27 = vpop.f32.mrf.mxu1 }
 0x348   : > { %1921 = vpow.bf16 %v1202_v23  ;;  %v1205_v14 = vmul.bf16 1069105081, %v1170_v3 }
 0x349   : > { %v1022_v31 = vpop.f32.mrf.mxu1 }
 0x34b   : > { %v1024_v32 = vpop.f32.mrf.mxu1 }
 0x34c   : > { %v1171_v33 = vpack.c.bf16 %v1024_v32, %v1020_v27 }
 0x34d   : > { %v1026_v22 = vpop.f32.mrf.mxu1 }
 0x34e   : > { %v1208_v46 = vmul.bf16 1069105081, %v1171_v33  ;;  %v1172_v30 = vpack.c.bf16 %v1026_v22, %v1022_v31 }
 0x34f   : > { %v1030_v24 = vpop.f32.mrf.mxu1 }
 0x350   : > { %1923 = vpow.bf16 %v1208_v46  ;;  %v1211_v16 = vmul.bf16 1069105081, %v1172_v30 }
 0x351   : > { %v1032_v1 = vpop.f32.mrf.mxu1 }
 0x353   : > { %v1034_v36 = vpop.f32.mrf.mxu1 }
 0x354   : > { %v1173_v42 = vpack.c.bf16 %v1034_v36, %v1030_v24 }
 0x355   : > { %v1036_v35 = vpop.f32.mrf.mxu1 }
 0x356   : > { %v1214_v0 = vmul.bf16 1069105081, %v1173_v42  ;;  %v2404_v48 = vpop.eup %1921  ;;  %v1174_v23 = vpack.c.bf16 %v1036_v35, %v1032_v1 }
 0x357   : > { %v1040_v44 = vpop.f32.mrf.mxu1  ;;  %v1297_v34 = vunpack.c.l.bf16 %v2404_v48  ;;  %v1299_v47 = vunpack.c.h.bf16 %v2404_v48 }
 0x358   : > { %1925 = vpow.bf16 %v1214_v0  ;;  %v1217_v33 = vmul.bf16 1069105081, %v1174_v23 }
 0x359   : > { %v1042_v28 = vpop.f32.mrf.mxu1  ;;  %v1361_v61 = vadd.f32 %v1299_v47, %v1297_v34 }
 0x35b   : > { %v1044_v49 = vpop.f32.mrf.mxu1 }
 0x35c   : > { %v1175_v52 = vpack.c.bf16 %v1044_v49, %v1040_v44 }
 0x35d   : > { %v1046_v59 = vpop.f32.mrf.mxu1 }
 0x35e   : > { %v2408_v45 = vpop.eup %1923  ;;  %v1220_v60 = vmul.bf16 1069105081, %v1175_v52  ;;  %v1176_v42 = vpack.c.bf16 %v1046_v59, %v1042_v28 }
 0x35f   : > { %v1301_v29 = vunpack.c.l.bf16 %v2408_v45  ;;  %v1050_v2 = vpop.f32.mrf.mxu1  ;;  %v1303_v25 = vunpack.c.h.bf16 %v2408_v45 }
 0x360   : > { %1927 = vpow.bf16 %v1220_v60  ;;  %v1223_v49 = vmul.bf16 1069105081, %v1176_v42 }
 0x361   : > { %v1362_v4 = vadd.f32 %v1361_v61, %v1301_v29  ;;  %v1052_v38 = vpop.f32.mrf.mxu1  ;;  %1929 = vpow.bf16 %v1205_v14 }
 0x362   : > { %1931 = vpow.bf16 %v1211_v16 }
 0x363   : > { %v1363_v9 = vadd.f32 %v1362_v4, %v1303_v25  ;;  %v1054_v10 = vpop.f32.mrf.mxu1 }
 0x364   : > { %v1177_v15 = vpack.c.bf16 %v1054_v10, %v1050_v2 }
 0x365   : > { %v1056_v17 = vpop.f32.mrf.mxu1 }
 0x366   : > { %v2412_v18 = vpop.eup %1925  ;;  %v1226_v19 = vmul.bf16 1069105081, %v1177_v15  ;;  %v1178_v61 = vpack.c.bf16 %v1056_v17, %v1052_v38 }
 0x367   : > { %v1305_v20 = vunpack.c.l.bf16 %v2412_v18  ;;  %v1060_v27 = vpop.f32.mrf.mxu1  ;;  %v1307_v37 = vunpack.c.h.bf16 %v2412_v18 }
 0x368   : > { %1933 = vpow.bf16 %v1226_v19  ;;  %v1229_v30 = vmul.bf16 1069105081, %v1178_v61 }
 0x369   : > { %v1364_v21 = vadd.f32 %v1363_v9, %v1305_v20  ;;  %v1062_v31 = vpop.f32.mrf.mxu1  ;;  %1935 = vpow.bf16 %v1217_v33 }
 0x36b   : > { %v1365_v32 = vadd.f32 %v1364_v21, %v1307_v37  ;;  %v1064_v22 = vpop.f32.mrf.mxu1 }
 0x36c   : > { %v1179_v46 = vpack.c.bf16 %v1064_v22, %v1060_v27 }
 0x36d   : > { %v1066_v24 = vpop.f32.mrf.mxu1 }
 0x36e   : > { %v2416_v36 = vpop.eup %1927  ;;  %v1232_v0 = vmul.bf16 1069105081, %v1179_v46  ;;  %v1180_v14 = vpack.c.bf16 %v1066_v24, %v1062_v31 }
 0x36f   : > { %v1309_v1 = vunpack.c.l.bf16 %v2416_v36  ;;  %v1070_v35 = vpop.f32.mrf.mxu1  ;;  %v1311_v44 = vunpack.c.h.bf16 %v2416_v36  ;;  %v2420_v3 = vpop.eup %1929 }
 0x370   : > { %1937 = vpow.bf16 %v1232_v0  ;;  %v2422_v59 = vpop.eup %1931  ;;  %v1298_v9 = vunpack.c.l.bf16 %v2420_v3  ;;  %v1300_v10 = vunpack.c.h.bf16 %v2420_v3  ;;  %v1235_v37 = vmul.bf16 1069105081, %v1180_v14 }
 0x371   : > { %v1366_v34 = vadd.f32 %v1365_v32, %v1309_v1  ;;  %v1072_v47 = vpop.f32.mrf.mxu1  ;;  %1939 = vpow.bf16 %v1223_v49  ;;  %v1302_v38 = vunpack.c.l.bf16 %v2422_v59  ;;  %v1304_v42 = vunpack.c.h.bf16 %v2422_v59 }
 0x372   : > { %v1398_v27 = vadd.f32 %v1300_v10, %v1298_v9 }
 0x373   : > { %v1367_v52 = vadd.f32 %v1366_v34, %v1311_v44  ;;  %v1074_v60 = vpop.f32.mrf.mxu1 }
 0x374   : > { %v1181_v29 = vpack.c.bf16 %v1074_v60, %v1070_v35  ;;  %v1399_v46 = vadd.f32 %v1398_v27, %v1302_v38 }
 0x375   : > { %v1076_v2 = vpop.f32.mrf.mxu1 }
 0x376   : > { %v1238_v28 = vmul.bf16 1069105081, %v1181_v29  ;;  %v2424_v4 = vpop.eup %1933  ;;  %v1182_v19 = vpack.c.bf16 %v1076_v2, %v1072_v47  ;;  %v1400_v49 = vadd.f32 %v1399_v46, %v1304_v42 }
 0x377   : > { %v1080_v25 = vpop.f32.mrf.mxu1  ;;  %v1313_v16 = vunpack.c.l.bf16 %v2424_v4  ;;  %v2430_v23 = vpop.eup %1935  ;;  %v1315_v44 = vunpack.c.h.bf16 %v2424_v4 }
 0x378   : > { %1941 = vpow.bf16 %v1238_v28  ;;  %v1241_v0 = vmul.bf16 1069105081, %v1182_v19  ;;  %v1306_v35 = vunpack.c.l.bf16 %v2430_v23 }
 0x379   : > { %v1082_v15 = vpop.f32.mrf.mxu1  ;;  %1943 = vpow.bf16 %v1229_v30  ;;  %v1368_v31 = vadd.f32 %v1367_v52, %v1313_v16  ;;  %v1308_v30 = vunpack.c.h.bf16 %v2430_v23 }
 0x37a   : > { %v1401_v52 = vadd.f32 %v1400_v49, %v1306_v35 }
 0x37b   : > { %v1084_v17 = vpop.f32.mrf.mxu1  ;;  %v1369_v60 = vadd.f32 %v1368_v31, %v1315_v44 }
 0x37c   : > { %v1183_v20 = vpack.c.bf16 %v1084_v17, %v1080_v25  ;;  %v1402_v38 = vadd.f32 %v1401_v52, %v1308_v30 }
 0x37d   : > { %v1086_v21 = vpop.f32.mrf.mxu1 }
 0x37e   : > { %v2432_v32 = vpop.eup %1937  ;;  %v1244_v33 = vmul.bf16 1069105081, %v1183_v20  ;;  %v1184_v22 = vpack.c.bf16 %v1086_v21, %v1082_v15 }
 0x37f   : > { %v1090_v24 = vpop.f32.mrf.mxu1  ;;  %v1317_v34 = vunpack.c.l.bf16 %v2432_v32  ;;  %v2438_v29 = vpop.eup %1939  ;;  %v1319_v10 = vunpack.c.h.bf16 %v2432_v32 }
 0x380   : > { %1945 = vpow.bf16 %v1244_v33  ;;  %v1247_v1 = vmul.bf16 1069105081, %v1184_v22  ;;  %v1310_v9 = vunpack.c.l.bf16 %v2438_v29  ;;  %v1312_v22 = vunpack.c.h.bf16 %v2438_v29 }
 0x381   : > { %1947 = vpow.bf16 %v1235_v37  ;;  %v1092_v47 = vpop.f32.mrf.mxu1  ;;  %v1370_v2 = vadd.f32 %v1369_v60, %v1317_v34 }
 0x382   : > { %1949 = vpow.bf16 %v1247_v1  ;;  %v1403_v27 = vadd.f32 %v1402_v38, %v1310_v9 }
 0x383   : > { %v1094_v61 = vpop.f32.mrf.mxu1  ;;  %1951 = vpow.bf16 %v1241_v0  ;;  %v1371_v16 = vadd.f32 %v1370_v2, %v1319_v10 }
 0x384   : > { %v1185_v20 = vpack.c.bf16 %v1094_v61, %v1090_v24  ;;  %v1404_v44 = vadd.f32 %v1403_v27, %v1312_v22 }
 0x385   : > { %v1096_v28 = vpop.f32.mrf.mxu1 }
 0x386   : > { %v1942_v25 = vpop.eup %1941  ;;  %v1186_v33 = vpack.c.bf16 %v1096_v28, %v1092_v47  ;;  %v1250_v1 = vmul.bf16 1069105081, %v1185_v20 }
 0x387   : > { %v1321_v14 = vunpack.c.l.bf16 %v1942_v25  ;;  %v1100_v15 = vpop.f32.mrf.mxu1  ;;  %v2443_v19 = vpop.eup %1943  ;;  %v1323_v31 = vunpack.c.h.bf16 %v1942_v25 }
 0x388   : > { %v1314_v46 = vunpack.c.l.bf16 %v2443_v19  ;;  %v1253_v24 = vmul.bf16 1069105081, %v1186_v33  ;;  %1953 = vpow.bf16 %v1250_v1 }
 0x389   : > { %v1102_v17 = vpop.f32.mrf.mxu1  ;;  %v1372_v37 = vadd.f32 %v1371_v16, %v1321_v14  ;;  %v1316_v14 = vunpack.c.h.bf16 %v2443_v19 }
 0x38a   : > { %v1405_v2 = vadd.f32 %v1404_v44, %v1314_v46  ;;  %1955 = vpow.bf16 %v1253_v24 }
 0x38b   : > { %v1104_v21 = vpop.f32.mrf.mxu1  ;;  %v1373_v34 = vadd.f32 %v1372_v37, %v1323_v31 }
 0x38c   : > { %v1187_v61 = vpack.c.bf16 %v1104_v21, %v1100_v15  ;;  %v1406_v37 = vadd.f32 %v1405_v2, %v1316_v14 }
 0x38d   : > { %v1106_v42 = vpop.f32.mrf.mxu1 }
 0x38e   : > { %v1946_v0 = vpop.eup %1945  ;;  %v1188_v10 = vpack.c.bf16 %v1106_v42, %v1102_v17  ;;  %v1256_v27 = vmul.bf16 1069105081, %v1187_v61 }
 0x38f   : > { %v1948_v35 = vpop.eup %1947  ;;  %v1325_v49 = vunpack.c.l.bf16 %v1946_v0  ;;  %v1110_v60 = vpop.f32.mrf.mxu1  ;;  %v1327_v30 = vunpack.c.h.bf16 %v1946_v0 }
 0x390   : > { %v2447_v52 = vpop.eup %1949  ;;  %v1318_v38 = vunpack.c.l.bf16 %v1948_v35  ;;  %v1259_v21 = vmul.bf16 1069105081, %v1188_v10  ;;  %1957 = vpow.bf16 %v1256_v27  ;;  %v1320_v44 = vunpack.c.h.bf16 %v1948_v35 }
 0x391   : > { %v1374_v47 = vadd.f32 %v1373_v34, %v1325_v49  ;;  %v1112_v28 = vpop.f32.mrf.mxu1  ;;  %1441 = vmatprep.subr.bf16.mxu0 %v2447_v52  ;;  %v1952_v9 = vpop.eup %1951  ;;  %v1326_v14 = vunpack.c.l.bf16 %v2447_v52 }
 0x392   : > { %1442 = vmatpush1.bf16.xpose.msra.mxu0 %v1946_v0  ;;  %v1407_v22 = vadd.f32 %v1406_v37, %v1318_v38  ;;  %v1322_v1 = vunpack.c.l.bf16 %v1952_v9  ;;  %1959 = vpow.bf16 %v1259_v21  ;;  %v2451_v0 = vpop.permute.xlu0 %435  ;;  %v1324_v10 = vunpack.c.h.bf16 %v1952_v9 }
 0x393   : > { %v1375_v16 = vadd.f32 %v1374_v47, %v1327_v30  ;;  %v1114_v20 = vpop.f32.mrf.mxu1  ;;  %1443 = vmatprep.subr.bf16.mxu0 %v1952_v9 }
 0x394   : > { %v1189_v33 = vpack.c.bf16 %v1114_v20, %v1110_v60  ;;  %v1408_v34 = vadd.f32 %v1407_v22, %v1320_v44  ;;  %v2453_v60 = vpop.permute.xlu1 %473  ;;  %v1328_v44 = vunpack.c.h.bf16 %v2447_v52 }
 0x395   : > { %v1116_v15 = vpop.f32.mrf.mxu1 }
 0x396   : > { %v1190_v31 = vpack.c.bf16 %v1116_v15, %v1112_v28  ;;  %v1262_v42 = vmul.bf16 1069105081, %v1189_v33  ;;  %v1409_v2 = vadd.f32 %v1408_v34, %v1322_v1  ;;  %v2455_v28 = vpop.permute.xlu0 %524 }
 0x397   : > { %v1120_v46 = vpop.f32.mrf.mxu1 }
 0x398   : > { %v1265_v24 = vmul.bf16 1069105081, %v1190_v31  ;;  %1961 = vpow.bf16 %v1262_v42  ;;  %v1410_v27 = vadd.f32 %v1409_v2, %v1324_v10  ;;  %v2463_v21 = vpop.permute.xlu1 %439 }
 0x399   : > { %v1122_v17 = vpop.f32.mrf.mxu1 }
 0x39a   : > { %1444 = vmatpush1.bf16.xpose.msra.mxu0 %v1942_v25  ;;  %v2458_v25 = vpop.eup %1953  ;;  %1963 = vpow.bf16 %v1265_v24  ;;  %v1411_v33 = vadd.f32 %v1410_v27, %v1326_v14  ;;  %v2467_v31 = vpop.permute.xlu0 %490 }
 0x39b   : > { %v1124_v49 = vpop.f32.mrf.mxu1  ;;  %1445 = vmatprep.subr.bf16.mxu0 %v1948_v35  ;;  %2791 = vst [vmem:[#allocation7_spill] sm:$0xff] %v2458_v25  ;;  %v2460_v37 = vpop.eup %1955  ;;  %v1329_v22 = vunpack.c.l.bf16 %v2458_v25 }
 0x39c   : > { %v1191_v61 = vpack.c.bf16 %v1124_v49, %v1120_v46  ;;  %2792 = vst [vmem:[#allocation8_spill] sm:$0xff] %v2460_v37  ;;  %v1330_v1 = vunpack.c.l.bf16 %v2460_v37  ;;  %v1412_v49 = vadd.f32 %v1411_v33, %v1328_v44 }
 0x39d   : > { %v1126_v30 = vpop.f32.mrf.mxu1  ;;  %v1376_v24 = vadd.f32 %v1375_v16, %v1329_v22  ;;  %v1332_v16 = vunpack.c.h.bf16 %v2460_v37 }
 0x39e   : > { %v1192_v47 = vpack.c.bf16 %v1126_v30, %v1122_v17  ;;  %v1268_v20 = vmul.bf16 1069105081, %v1191_v61  ;;  %v2471_v42 = vpop.eup %1957  ;;  %v2475_v30 = vpop.permute.xlu1 %486  ;;  %v1413_v10 = vadd.f32 %v1412_v49, %v1330_v1 }
 0x39f   : > { %v1130_v38 = vpop.f32.mrf.mxu1  ;;  %2793 = vst [vmem:[#allocation9_spill] sm:$0xff] %v2471_v42  ;;  %v1333_v52 = vunpack.c.l.bf16 %v2471_v42 }
 0x3a0   : > { %v1271_v15 = vmul.bf16 1069105081, %v1192_v47  ;;  %1965 = vpow.bf16 %v1268_v20  ;;  %v2473_v2 = vpop.eup %1959  ;;  %v1331_v47 = vunpack.c.h.bf16 %v2458_v25 }
 0x3a1   : > { %v1132_v35 = vpop.f32.mrf.mxu1  ;;  %2794 = vst [vmem:[#allocation10_spill] sm:$0xff] %v2473_v2  ;;  %v1334_v27 = vunpack.c.l.bf16 %v2473_v2 }
 0x3a2   : > { %1446 = vmatpush1.bf16.xpose.msra.mxu0 %v2432_v32  ;;  %1967 = vpow.bf16 %v1271_v15  ;;  %v1377_v20 = vadd.f32 %v1376_v24, %v1331_v47  ;;  %v2487_v22 = vpop.permute.xlu1 %575 }
 0x3a3   : > { %v1134_v9 = vpop.f32.mrf.mxu1  ;;  %1447 = vmatprep.subr.bf16.mxu0 %v2443_v19 }
 0x3a4   : > { %v1193_v46 = vpack.c.bf16 %v1134_v9, %v1130_v38  ;;  %v2480_v38 = vpop.permute.xlu0 %537  ;;  %v1414_v9 = vadd.f32 %v1413_v10, %v1332_v16 }
 0x3a5   : > { %v1136_v17 = vpop.f32.mrf.mxu1 }
 0x3a6   : > { %v1274_v32 = vmul.bf16 1069105081, %v1193_v46  ;;  %v1194_v34 = vpack.c.bf16 %v1136_v17, %v1132_v35  ;;  %v2485_v15 = vpop.eup %1961  ;;  %v1378_v46 = vadd.f32 %v1377_v20, %v1333_v52 }
 0x3a7   : > { %v1140_v61 = vpop.f32.mrf.mxu1  ;;  %2795 = vst [vmem:[#allocation11_spill] sm:$0xff] %v2485_v15  ;;  %v1337_v49 = vunpack.c.l.bf16 %v2485_v15 }
 0x3a8   : > { %v1277_v19 = vmul.bf16 1069105081, %v1194_v34  ;;  %1969 = vpow.bf16 %v1274_v32  ;;  %v1335_v32 = vunpack.c.h.bf16 %v2471_v42  ;;  %v1415_v34 = vadd.f32 %v1414_v9, %v1334_v27  ;;  %v2493_v47 = vpop.permute.xlu0 %626 }
 0x3a9   : > { %v1142_v14 = vpop.f32.mrf.mxu1 }
 0x3aa   : > { %1448 = vmatpush1.bf16.xpose.msra.mxu0 %v2424_v4  ;;  %1971 = vpow.bf16 %v1277_v19  ;;  %v2489_v4 = vpop.eup %1963  ;;  %v1336_v19 = vunpack.c.h.bf16 %v2473_v2 }
 0x3ab   : > { %v1144_v35 = vpop.f32.mrf.mxu1  ;;  %1449 = vmatprep.subr.bf16.mxu0 %v2438_v29  ;;  %2796 = vst [vmem:[#allocation12_spill] sm:$0xff] %v2489_v4  ;;  %v1338_v10 = vunpack.c.l.bf16 %v2489_v4 }
 0x3ac   : > { %v1195_v33 = vpack.c.bf16 %v1144_v35, %v1140_v61  ;;  %v1379_v61 = vadd.f32 %v1378_v46, %v1335_v32  ;;  %v1416_v16 = vadd.f32 %v1415_v34, %v1336_v19  ;;  %v1339_v46 = vunpack.c.h.bf16 %v2485_v15  ;;  %v2507_v41 = vpop.permute.xlu0 %592 }
 0x3ad   : > { %v1146_v44 = vpop.f32.mrf.mxu1  ;;  %v1340_v34 = vunpack.c.h.bf16 %v2489_v4 }
 0x3ae   : > { %v1280_v1 = vmul.bf16 1069105081, %v1195_v33  ;;  %v1196_v17 = vpack.c.bf16 %v1146_v44, %v1142_v14  ;;  %v2497_v20 = vpop.eup %1965  ;;  %v2500_v14 = vpop.permute.xlu1 %541  ;;  %v1380_v27 = vadd.f32 %v1379_v61, %v1337_v49  ;;  %v1417_v44 = vadd.f32 %v1416_v16, %v1338_v10 }
 0x3af   : > { %v1150_v24 = vpop.f32.mrf.mxu1  ;;  %2797 = vst [vmem:[#allocation13_spill] sm:$0xff] %v2497_v20 }
 0x3b0   : > { %1973 = vpow.bf16 %v1280_v1  ;;  %v1283_v29 = vmul.bf16 1069105081, %v1196_v17  ;;  %v2503_v33 = vpop.eup %1967  ;;  %v1341_v1 = vunpack.c.l.bf16 %v2497_v20  ;;  %v1418_v10 = vadd.f32 %v1417_v44, %v1340_v34 }
 0x3b1   : > { %v1152_v52 = vpop.f32.mrf.mxu1  ;;  %v1342_v49 = vunpack.c.l.bf16 %v2503_v33  ;;  %v1344_v44 = vunpack.c.h.bf16 %v2503_v33 }
 0x3b2   : > { %1975 = vpow.bf16 %v1283_v29  ;;  %1450 = vmatpush1.bf16.xpose.msra.mxu0 %v2416_v36  ;;  %v1381_v36 = vadd.f32 %v1380_v27, %v1339_v46  ;;  %v2513_v19 = vpop.permute.xlu1 %588 }
 0x3b3   : > { %v1154_v35 = vpop.f32.mrf.mxu1  ;;  %1451 = vmatprep.subr.bf16.mxu0 %v2430_v23  ;;  %v1419_v27 = vadd.f32 %v1418_v10, %v1342_v49 }
 0x3b4   : > { %v1197_v9 = vpack.c.bf16 %v1154_v35, %v1150_v24  ;;  %v1382_v16 = vadd.f32 %v1381_v36, %v1341_v1 }
 0x3b5   : > { %v1156_v17 = vpop.f32.mrf.mxu1  ;;  %v1420_v49 = vadd.f32 %v1419_v27, %v1344_v44 }
 0x3b6   : > { %v1286_v32 = vmul.bf16 1069105081, %v1197_v9  ;;  %v1198_v29 = vpack.c.bf16 %v1156_v17, %v1152_v52  ;;  %v2511_v23 = vpop.eup %1969  ;;  %v1343_v52 = vunpack.c.h.bf16 %v2497_v20  ;;  %v2527_v25 = vpop.permute.xlu1 %677 }
 0x3b7   : > { %v1160_v61 = vpop.f32.mrf.mxu1  ;;  %v1345_v9 = vunpack.c.l.bf16 %v2511_v23 }
 0x3b8   : > { %1977 = vpow.bf16 %v1286_v32  ;;  %v1289_v24 = vmul.bf16 1069105081, %v1198_v29  ;;  %v2515_v40 = vpop.eup %1971  ;;  %v2521_v32 = vpop.permute.xlu0 %639  ;;  %v1383_v29 = vadd.f32 %v1382_v16, %v1343_v52 }
 0x3b9   : > { %v1162_v35 = vpop.f32.mrf.mxu1  ;;  %v1346_v1 = vunpack.c.l.bf16 %v2515_v40 }
 0x3ba   : > { %1979 = vpow.bf16 %v1289_v24  ;;  %1452 = vmatpush1.bf16.xpose.msra.mxu0 %v2412_v18  ;;  %v1384_v10 = vadd.f32 %v1383_v29, %v1345_v9  ;;  %v2539_v9 = vpop.permute.xlu1 %643 }
 0x3bb   : > { %v1164_v46 = vpop.f32.mrf.mxu1  ;;  %1453 = vmatprep.subr.bf16.mxu0 %v2422_v59  ;;  %v1421_v16 = vadd.f32 %v1420_v49, %v1346_v1 }
 0x3bc   : > { %v1199_v17 = vpack.c.bf16 %v1164_v46, %v1160_v61  ;;  %v1347_v61 = vunpack.c.h.bf16 %v2511_v23  ;;  %v2534_v46 = vpop.permute.xlu0 %728 }
 0x3bd   : > { %v1166_v36 = vpop.f32.mrf.mxu1 }
 0x3be   : > { %v2525_v34 = vpop.eup %1973  ;;  %v1292_v18 = vmul.bf16 1069105081, %v1199_v17  ;;  %v1200_v24 = vpack.c.bf16 %v1166_v36, %v1162_v35  ;;  %v1385_v17 = vadd.f32 %v1384_v10, %v1347_v61  ;;  %v1348_v35 = vunpack.c.h.bf16 %v2515_v40 }
 0x3bf   : > { %v1349_v52 = vunpack.c.l.bf16 %v2525_v34  ;;  %v1351_v1 = vunpack.c.h.bf16 %v2525_v34 }
 0x3c0   : > { %v2529_v37 = vpop.eup %1975  ;;  %1981 = vpow.bf16 %v1292_v18  ;;  %v1295_v59 = vmul.bf16 1069105081, %v1200_v24  ;;  %v1422_v44 = vadd.f32 %v1421_v16, %v1348_v35  ;;  %v2545_v49 = vpop.permute.xlu0 %694  ;;  %v445_v35 = vsel %vm443_vm2, %v2451_v0, %v2463_v21 }
 0x3c1   : > { %v1350_v27 = vunpack.c.l.bf16 %v2529_v37  ;;  %v1386_v29 = vadd.f32 %v1385_v17, %v1349_v52  ;;  %v2553_v16 = vpop.permute.xlu1 %690 }
 0x3c2   : > { %1983 = vpow.bf16 %v1295_v59  ;;  %1454 = vmatpush1.bf16.xpose.msra.mxu0 %v2408_v45  ;;  %v1352_v59 = vunpack.c.h.bf16 %v2529_v37 }
 0x3c3   : > { %1455 = vmatprep.subr.bf16.mxu0 %v2420_v3  ;;  %v1423_v45 = vadd.f32 %v1422_v44, %v1350_v27  ;;  %v1387_v10 = vadd.f32 %v1386_v29, %v1351_v1  ;;  %v447_v3 = vsel %vm443_vm2, %v2463_v21, %v2451_v0  ;;  %v494_v1 = vsel %vm492_vm3, %v2475_v30, %v2467_v31 }
 0x3c5   : > { %v1424_v17 = vadd.f32 %v1423_v45, %v1352_v59  ;;  %v2569_v45 = vpop.permute.xlu0 %741 }
 0x3c6   : > { %v2541_v36 = vpop.eup %1977 }
 0x3c7   : > { %v1353_v18 = vunpack.c.l.bf16 %v2541_v36  ;;  %v1355_v27 = vunpack.c.h.bf16 %v2541_v36 }
 0x3c8   : > { %v1980_v24 = vpop.eup %1979 }
 0x3c9   : > { %v1354_v61 = vunpack.c.l.bf16 %v1980_v24  ;;  %v1388_v52 = vadd.f32 %v1387_v10, %v1353_v18  ;;  %v496_v18 = vsel %vm492_vm3, %v2467_v31, %v2475_v30  ;;  %v1356_v0 = vunpack.c.h.bf16 %v1980_v24 }
 0x3ca   : > { %1456 = vmatpush1.bf16.xpose.msra.mxu0 %v2404_v48  ;;  %v462_v48 = vmul.f32 %v2172_v50, %v447_v3  ;;  %v545_v3 = vsel %vm543_vm4, %v2480_v38, %v2500_v14  ;;  %v2580_v50 = vpop.permute.xlu1 %779 }
 0x3cb   : > { %v1425_v29 = vadd.f32 %v1424_v17, %v1354_v61  ;;  %v1389_v21 = vadd.f32 %v1388_v52, %v1355_v27  ;;  %v463_v61 = vmul.f32 %v2175_v51, %v445_v35  ;;  %v547_v17 = vsel %vm543_vm4, %v2500_v14, %v2480_v38 }
 0x3cc   : > { %v512_v27 = vmul.f32 %v2182_v53, %v496_v18  ;;  %v513_v35 = vmul.f32 %v2185_v54, %v494_v1  ;;  %v478_v51 = vmul.f32 %v2453_v60, %v462_v48  ;;  %v563_v14 = vmul.f32 %v2189_v55, %v547_v17 }
 0x3cd   : > { %v1426_v30 = vadd.f32 %v1425_v29, %v1356_v0  ;;  %v479_v38 = vmul.f32 %v2453_v60, %v463_v61  ;;  %v564_v20 = vmul.f32 %v2192_v56, %v545_v3  ;;  %v598_v53 = vsel %vm594_vm5, %v2507_v41, %v2513_v19  ;;  %v2592_v29 = vpop.permute.xlu0 %830 }
 0x3ce   : > { %v1982_v44 = vpop.eup %1981  ;;  %v530_v60 = vmul.f32 %v2455_v28, %v513_v35  ;;  %v596_v55 = vsel %vm594_vm5, %v2513_v19, %v2507_v41  ;;  %v614_v56 = vmul.f32 %v2196_v57, %v598_v53  ;;  %v649_v41 = vsel %vm645_vm6, %v2539_v9, %v2521_v32 }
 0x3cf   : > { %v1357_v10 = vunpack.c.l.bf16 %v1982_v44  ;;  %v1359_v42 = vunpack.c.h.bf16 %v1982_v44  ;;  %v581_v18 = vmul.f32 %v2487_v22, %v564_v20  ;;  %v698_v57 = vsel %vm696_vm7, %v2553_v16, %v2545_v49 }
 0x3d0   : > { %v1984_v59 = vpop.eup %1983  ;;  %v631_v20 = vmul.f32 %v2493_v47, %v614_v56 }
 0x3d1   : > { %1457 = vmatprep.subr.bf16.mxu0 %v1984_v59  ;;  %v1358_v31 = vunpack.c.l.bf16 %v1984_v59  ;;  %v1390_v52 = vadd.f32 %v1389_v21, %v1357_v10  ;;  %v1360_v2 = vunpack.c.h.bf16 %v1984_v59  ;;  %v797_v0 = vpop.permute.xlu0 %796  ;;  %v666_v21 = vmul.f32 %v2209_v63, %v649_v41 }
 0x3d2   : > { %1458 = vmatpush2.bf16.xpose.msra.mxu0 %v1982_v44  ;;  %v700_v59 = vsel %vm696_vm7, %v2545_v49, %v2553_v16 }
 0x3d3   : > { %1459 = vmatprep.subr.bf16.mxu0 %v1980_v24  ;;  %v1427_v15 = vadd.f32 %v1426_v30, %v1358_v31  ;;  %v1391_v4 = vadd.f32 %v1390_v52, %v1359_v42  ;;  %v432_v24 = vmul.f32 %v2335_v6, %v2333_v5  ;;  %v529_v42 = vmul.f32 %v2455_v28, %v512_v27 }
 0x3d4   : > { %v482_v5 = vadd.f32 %v478_v51, %v2341_v26  ;;  %v580_v28 = vmul.f32 %v2487_v22, %v563_v14  ;;  %v615_v51 = vmul.f32 %v2199_v58, %v596_v55  ;;  %v716_v58 = vmul.f32 %v2228_v11, %v698_v57  ;;  %v2801_v57 = vld [vmem:[#allocation10_spill] sm:$0xff] }
 0x3d5   : > { %v1428_v54 = vadd.f32 %v1427_v15, %v1360_v2  ;;  %v1392_v44 = vrot.slane %v1391_v4, 4  ;;  %v647_v2 = vsel %vm645_vm6, %v2521_v32, %v2539_v9  ;;  %v746_v15 = vpop.permute.xlu1 %745  ;;  %v483_v6 = vadd.f32 %v479_v38, %v432_v24 }
 0x3d6   : > { %v665_v26 = vmul.f32 %v2206_v62, %v647_v2  ;;  %v749_v62 = vsel %vm747_vm8, %v2569_v45, %v746_v15  ;;  %v632_v31 = vmul.f32 %v2493_v47, %v615_v51  ;;  %v751_v30 = vsel %vm747_vm8, %v746_v15, %v2569_v45 }
 0x3d7   : > { %v1429_v48 = vrot.slane %v1428_v54, 4  ;;  %v1393_v1 = vadd.f32 %v1392_v44, %v1391_v4  ;;  %v533_v4 = vadd.f32 %v529_v42, %v482_v5  ;;  %v534_v22 = vadd.f32 %v530_v60, %v483_v6 }
 0x3d8   : > { %v682_v63 = vmul.f32 %v2527_v25, %v665_v26  ;;  %v717_v49 = vmul.f32 %v2231_v12, %v700_v59  ;;  %v767_v16 = vmul.f32 %v2235_v13, %v749_v62  ;;  %v683_v38 = vmul.f32 %v2527_v25, %v666_v21  ;;  %v2806_v59 = vld [vmem:[#allocation4_spill] sm:$0xff] }
 0x3d9   : > { %v1430_v19 = vadd.f32 %v1429_v48, %v1428_v54  ;;  %v1394_v10 = vrot.slane %v1393_v1, 2  ;;  %v585_v61 = vadd.f32 %v581_v18, %v534_v22  ;;  %v793_v3 = vpop.permute.xlu1 %792  ;;  %v733_v47 = vmul.f32 %v2534_v46, %v716_v58  ;;  %v2799_v18 = vld [vmem:[#allocation12_spill] sm:$0xff] }
 0x3da   : > { %1460 = vmatpush2.bf16.xpose.msra.mxu0 %v2541_v36  ;;  %v584_v36 = vadd.f32 %v580_v28, %v533_v4  ;;  %v800_v11 = vsel %vm798_vm9, %v793_v3, %v797_v0  ;;  %v802_v14 = vsel %vm798_vm9, %v797_v0, %v793_v3  ;;  %v768_v53 = vmul.f32 %v2250_v43, %v751_v30  ;;  %v2798_v28 = vld [vmem:[#allocation13_spill] sm:$0xff]  ;;  %v1890_v62 = vld [vmem:[%s2766_s1 + $0x10] ss:$8 sm:$0x3] }
 0x3db   : > { %1461 = vmatprep.subr.bf16.mxu0 %v2529_v37  ;;  %v1431_v32 = vrot.slane %v1430_v19, 2  ;;  %v1395_v9 = vadd.f32 %v1394_v10, %v1393_v1  ;;  %v818_v45 = vmul.f32 %v2275_v7, %v800_v11  ;;  %v636_v44 = vadd.f32 %v632_v31, %v585_v61  ;;  %v1889_v0 = vld [vmem:[%s2766_s1 + $0x7] ss:$8 sm:$0x3] }
 0x3dc   : > { %v635_v35 = vadd.f32 %v631_v20, %v584_v36  ;;  %v734_v13 = vmul.f32 %v2534_v46, %v717_v49  ;;  %v784_v24 = vmul.f32 %v2580_v50, %v767_v16  ;;  %v819_v25 = vmul.f32 %v2278_v8, %v802_v14  ;;  %v1683_v20 = vld [vmem:[%s2772_s7] sm:$0xf]  ;;  %v1887_v11 = vld [vmem:[%s2766_s1 + $0x5] ss:$8 sm:$0x3] }
 0x3dd   : > { %v1432_v17 = vadd.f32 %v1431_v32, %v1430_v19  ;;  %v1396_v37 = vrot.slane %v1395_v9, 1  ;;  %v687_v42 = vadd.f32 %v683_v38, %v636_v44  ;;  %v785_v43 = vmul.f32 %v2580_v50, %v768_v53  ;;  %v851_v8 = vpop.permute.xlu1 %850  ;;  %v2804_v19 = vld [vmem:[#allocation7_spill] sm:$0xff] }
 0x3de   : > { %v686_v12 = vadd.f32 %v682_v63, %v635_v35  ;;  %v835_v7 = vmul.f32 %v2592_v29, %v818_v45  ;;  %v836_v2 = vmul.f32 %v2592_v29, %v819_v25  ;;  %v2800_v29 = vld [vmem:[#allocation11_spill] sm:$0xff]  ;;  %v1637_v58 = vrot.slane %v1889_v0, %v2806_v59 }
 0x3df   : > { %v1433_v52 = vrot.slane %v1432_v17, 1  ;;  %v1397_v27 = vadd.f32 %v1396_v37, %v1395_v9  ;;  %v738_v55 = vadd.f32 %v734_v13, %v687_v42  ;;  %v2805_v9 = vld [vmem:[#allocation3_spill] sm:$0xff]  ;;  %v1665_v30 = vrot.slane %v1890_v62, %v2806_v59 }
 0x3e0   : > { %v737_v60 = vadd.f32 %v733_v47, %v686_v12  ;;  %v1633_v21 = vrot.slane %v1889_v0, %v2805_v9  ;;  %v1661_v63 = vrot.slane %v1890_v62, %v2805_v9  ;;  %v1583_v53 = vrot.slane %v1887_v11, %v2805_v9 }
 0x3e1   : > { %v1434_v54 = vadd.f32 %v1433_v52, %v1432_v17  ;;  %1985 = vrcp.f32 %v1397_v27  ;;  %v1587_v45 = vrot.slane %v1887_v11, %v2806_v59 }
 0x3e2   : > { %1462 = vmatpush2.bf16.xpose.msra.mxu0 %v2525_v34  ;;  %v788_v56 = vadd.f32 %v784_v24, %v737_v60  ;;  %v789_v34 = vadd.f32 %v785_v43, %v738_v55 }
 0x3e3   : > { %1463 = vmatprep.subr.bf16.mxu0 %v2515_v40  ;;  %1987 = vrcp.f32 %v1434_v54  ;;  %v1888_v54 = vld [vmem:[%s2766_s1 + $0x6] ss:$8 sm:$0x3] }
 0x3e4   : > { %v839_v15 = vadd.f32 %v835_v7, %v788_v56  ;;  %v840_v46 = vadd.f32 %v836_v2, %v789_v34  ;;  %v1611_v60 = vrot.slane %v1888_v54, %v2805_v9  ;;  %v1615_v43 = vrot.slane %v1888_v54, %v2806_v59  ;;  %v1886_v7 = vld [vmem:[%s2766_s1 + $0x3] ss:$8 sm:$0x3] }
 0x3e6   : > { %v855_v40 = vadd.f32 %v851_v8, %v839_v15  ;;  %v856_v1 = vadd.f32 %v851_v8, %v840_v46 }
 0x3ea   : > { %1464 = vmatpush2.bf16.xpose.msra.mxu0 %v2511_v23  ;;  %v2802_v23 = vld [vmem:[#allocation9_spill] sm:$0xff] }
 0x3eb   : > { %1465 = vmatprep.subr.bf16.mxu0 %v2503_v33  ;;  %v2803_v33 = vld [vmem:[#allocation8_spill] sm:$0xff] }
 0x3ee   : > { %v1986_v48 = vpop.eup %1985 }
 0x3ef   : > { %v1437_v5 = vmul.f32 %v1986_v48, %v855_v40  ;;  %v1553_v48 = vrot.slane %v1886_v7, %v2805_v9 }
 0x3f0   : > { %v1988_v6 = vpop.eup %1987 }
 0x3f1   : > { %v1438_v50 = vmul.f32 %v1988_v6, %v856_v1  ;;  %v1439_v10 = vpack.c.bf16 %v1437_v5, %v1437_v5  ;;  %v1557_v1 = vrot.slane %v1886_v7, %v2806_v59  ;;  %v1884_v5 = vld [vmem:[%s2766_s1 + $0x1] ss:$8 sm:$0x3] }
 0x3f2   : > { %1466 = vmatpush2.bf16.xpose.msra.mxu0 %v2798_v28 }
 0x3f3   : > { %1467 = vmatprep.subr.bf16.mxu0 %v2799_v18  ;;  %v1440_v41 = vpack.c.bf16 %v1438_v50, %v1438_v50 }
 0x3f5   : > { %1473 = vmatprep.mubr.bf16.mxu0 %v1440_v41 }
 0x3fa   : > { %1468 = vmatpush2.bf16.xpose.msra.mxu0 %v2800_v29 }
 0x3fb   : > { %1469 = vmatprep.subr.bf16.mxu0 %v2801_v57 }
 0x402   : > { %1470 = vmatpush2.bf16.xpose.msra.mxu0 %v2802_v23 }
 0x403   : > { %1471 = vmatprep.subr.bf16.mxu0 %v2803_v33  ;;  %v1503_v33 = vrot.slane %v1884_v5, %v2805_v9 }
 0x40a   : > { %1472 = vmatpush2.bf16.xpose.msra.mxu0 %v2804_v19  ;;  %v1507_v19 = vrot.slane %v1884_v5, %v2806_v59 }
 0x411   : > { %1474 = vmatmul.mubr.bf16.vlgmr.msra.gmra.mxu0 %v1439_v10  ;;  %v1885_v10 = vld [vmem:[%s2766_s1 + $0x2] ss:$8 sm:$0x3] }
 0x412   : > { %v1535_v62 = vrot.slane %v1885_v10, %v2806_v59 }
 0x4d1   : > { %v1475_v4 = vpop.f32.mrf.mxu0 }
 0x4d2   : > { %1570 = vst [vmem:[#allocation2 + $0x48] sm:$0xf] %v1475_v4  ;;  %1622 = vrot.lane.b32.xlu0 %v1475_v4, %s2006_s22 }
 0x4d3   : > { %v1477_v51 = vpop.f32.mrf.mxu0 }
 0x4d4   : > { %1571 = vst [vmem:[#allocation2 + $0x28] sm:$0xf] %v1477_v51  ;;  %1624 = vrot.lane.b32.xlu1 %v1477_v51, %s2006_s22 }
 0x4d5   : > { %v1479_v26 = vpop.f32.mrf.mxu0 }
 0x4d6   : > { %1650 = vrot.lane.b32.xlu0 %v1475_v4, %s2005_s21 }
 0x4d7   : > { %v1480_v22 = vpop.f32.mrf.mxu0 }
 0x4d8   : > { %1652 = vrot.lane.b32.xlu1 %v1477_v51, %s2005_s21 }
 0x4da   : > { %1572 = vrot.lane.b32.xlu0 %v1475_v4, %s2004_s20 }
 0x4dc   : > { %1574 = vrot.lane.b32.xlu1 %v1477_v51, %s2004_s20  ;;  %s307_s20 = scalar_lea.vmem %s2773_s8, %s1837_s16 }
 0x4de   : > { %1600 = vrot.lane.b32.xlu0 %v1475_v4, %s2003_s19 }
 0x4e0   : > { %1602 = vrot.lane.b32.xlu1 %v1477_v51, %s2003_s19 }
 0x4e2   : > { %1542 = vrot.lane.b32.xlu0 %v1475_v4, %s2001_s17 }
 0x4e4   : > { %1544 = vrot.lane.b32.xlu1 %v1477_v51, %s2001_s17 }
 0x4e6   : > { %1492 = vrot.lane.b32.xlu0 %v1475_v4, %s1999_s14 }
 0x4e8   : > { %1494 = vrot.lane.b32.xlu1 %v1477_v51, %s1999_s14 }
 0x4ea   : > { %1520 = vrot.lane.b32.xlu0 %v1475_v4, %s2002_s18 }
 0x4ec   : > { %1522 = vrot.lane.b32.xlu1 %v1477_v51, %s2002_s18 }
 0x4ee   : > { %1482 = vrot.lane.b32.xlu0 %v1475_v4, %s2000_s15 }
 0x4f0   : > { %1484 = vrot.lane.b32.xlu1 %v1477_v51, %s2000_s15 }
 0x4f2   : > { %1686 = vperm.xlu0 %1914, %v1683_v20  }
 0x544   : > { %v1623_v32 = vpop.permute.xlu0 %1622 }
 0x546   : > { %v1625_v36 = vpop.permute.xlu1 %1624 }
 0x547   : > { %v1626_v61 = vsel %vm747_vm8, %v1623_v32, %v1625_v36  ;;  %v1627_v3 = vsel %vm747_vm8, %v1625_v36, %v1623_v32 }
 0x548   : > { %v1640_v17 = vmul.f32 %v1633_v21, %v1626_v61  ;;  %v1641_v37 = vmul.f32 %v1637_v58, %v1627_v3  ;;  %v1651_v31 = vpop.permute.xlu0 %1650  ;;  %v1531_v58 = vrot.slane %v1885_v10, %v2805_v9 }
 0x54a   : > { %v1644_v49 = vrot.slane %v1640_v17, 4  ;;  %v1645_v16 = vrot.slane %v1641_v37, 4  ;;  %v1653_v52 = vpop.permute.xlu1 %1652 }
 0x54b   : > { %v1654_v27 = vsel %vm798_vm9, %v1651_v31, %v1653_v52  ;;  %v1655_v35 = vsel %vm798_vm9, %v1653_v52, %v1651_v31 }
 0x54c   : > { %1648 = vst [vmem:[#allocation2 + $0x8] sm:$0xf0] %v1644_v49  ;;  %1649 = vst [vmem:[#allocation2 + $0x20] sm:$0xf0] %v1645_v16  ;;  %v1668_v38 = vmul.f32 %v1661_v63, %v1654_v27  ;;  %v1669_v47 = vmul.f32 %v1665_v30, %v1655_v35  ;;  %v1573_v14 = vpop.permute.xlu0 %1572  ;;  %v2807_v35 = vld [vmem:[#allocation5_spill] sm:$0xff] }
 0x54e   : > { %1670 = vst [vmem:[#allocation2 + $0x40] sm:$0xf] %v1668_v38  ;;  %1671 = vst [vmem:[#allocation2 + $0x38] sm:$0xf] %v1669_v47  ;;  %v1575_v44 = vpop.permute.xlu1 %1574  ;;  %v2808_v47 = vld [vmem:[#allocation6_spill] sm:$0xff] }
 0x54f   : > { %v1576_v12 = vsel %vm645_vm6, %v1573_v14, %v1575_v44  ;;  %v1577_v13 = vsel %vm645_vm6, %v1575_v44, %v1573_v14 }
 0x550   : > { %v1590_v24 = vmul.f32 %v1583_v53, %v1576_v12  ;;  %v1591_v25 = vmul.f32 %v1587_v45, %v1577_v13  ;;  %v1601_v42 = vpop.permute.xlu0 %1600  ;;  %v1672_v12 = vld [vmem:[%s2771_s6] sm:$0xf] }
 0x552   : > { %v1594_v55 = vrot.slane %v1590_v24, 4  ;;  %v1595_v56 = vrot.slane %v1591_v25, 4  ;;  %v1603_v2 = vpop.permute.xlu1 %1602 }
 0x553   : > { %v1604_v34 = vsel %vm696_vm7, %v1601_v42, %v1603_v2  ;;  %v1605_v15 = vsel %vm696_vm7, %v1603_v2, %v1601_v42 }
 0x554   : > { %1598 = vst [vmem:[#allocation2 + $0x48] sm:$0xf0] %v1594_v55  ;;  %1599 = vst [vmem:[#allocation2 + $0x28] sm:$0xf0] %v1595_v56  ;;  %v1618_v46 = vmul.f32 %v1611_v60, %v1604_v34  ;;  %v1619_v8 = vmul.f32 %v1615_v43, %v1605_v15  ;;  %v1543_v40 = vpop.permute.xlu0 %1542 }
 0x555   : > { %v1682_v6 = vld [vmem:[#allocation2 + $0x38] sm:$0xf]  ;;  %v1681_v50 = vld [vmem:[#allocation2 + $0x40] sm:$0xf] }
 0x556   : > { %1620 = vst [vmem:[#allocation2 + $0x8] sm:$0xf] %v1618_v46  ;;  %1621 = vst [vmem:[#allocation2 + $0x20] sm:$0xf] %v1619_v8  ;;  %1891 = vmatprep.subr.msk.mxu1 %vm334_vm0, %v1682_v6  ;;  %v1545_v28 = vpop.permute.xlu1 %1544 }
 0x557   : > { %v1546_v18 = vsel %vm594_vm5, %v1543_v40, %v1545_v28  ;;  %v1547_v41 = vsel %vm594_vm5, %v1545_v28, %v1543_v40  ;;  %1892 = vmatpush1.msk.msra.mxu1 %vm334_vm0, %v1681_v50 }
 0x558   : > { %v1560_v29 = vmul.f32 %v1553_v48, %v1547_v41  ;;  %v1561_v57 = vmul.f32 %v1557_v1, %v1546_v18  ;;  %v1493_v23 = vpop.permute.xlu0 %1492 }
 0x55a   : > { %v1564_v4 = vrot.slane %v1560_v29, 4  ;;  %v1565_v51 = vrot.slane %v1561_v57, 4  ;;  %v1495_v26 = vpop.permute.xlu1 %1494 }
 0x55b   : > { %v1496_v22 = vsel %vm492_vm3, %v1493_v23, %v1495_v26  ;;  %v1497_v20 = vsel %vm492_vm3, %v1495_v26, %v1493_v23  ;;  %v1678_v30 = vld [vmem:[#allocation2 + $0x28] sm:$0xff] }
 0x55c   : > { %1568 = vst [vmem:[#allocation2 + $0x18] sm:$0xf0] %v1564_v4  ;;  %1569 = vst [vmem:[#allocation2 + $0x10] sm:$0xf0] %v1565_v51  ;;  %v1510_v0 = vmul.f32 %v1503_v33, %v1497_v20  ;;  %v1511_v32 = vmul.f32 %v1507_v19, %v1496_v22  ;;  %v1521_v21 = vpop.permute.xlu0 %1520  ;;  %v1677_v59 = vld [vmem:[#allocation2 + $0x48] sm:$0xff] }
 0x55d   : > { %v1680_v36 = vld [vmem:[#allocation2 + $0x20] sm:$0xff]  ;;  %v1679_v61 = vld [vmem:[#allocation2 + $0x8] sm:$0xff] }
 0x55e   : > { %v1514_v3 = vrot.slane %v1510_v0, 4  ;;  %v1515_v17 = vrot.slane %v1511_v32, 4  ;;  %1723 = vmatprep.subr.mxu1 %v1680_v36  ;;  %v1523_v37 = vpop.permute.xlu1 %1522 }
 0x55f   : > { %v1524_v31 = vsel %vm543_vm4, %v1521_v21, %v1523_v37  ;;  %v1525_v63 = vsel %vm543_vm4, %v1523_v37, %v1521_v21  ;;  %1724 = vmatpush1.msra.mxu1 %v1679_v61 }
 0x560   : > { %1518 = vst [vmem:[#allocation2 + $0x30] sm:$0xf0] %v1514_v3  ;;  %1519 = vst [vmem:[#allocation2] sm:$0xf0] %v1515_v17  ;;  %v1538_v11 = vmul.f32 %v1531_v58, %v1525_v63  ;;  %v1539_v9 = vmul.f32 %v1535_v62, %v1524_v31  ;;  %1725 = vmatprep.subr.mxu1 %v1678_v30  ;;  %v1483_v49 = vpop.permute.xlu0 %1482 }
 0x561   : > { %1726 = vmatpush1.msra.mxu1 %v1677_v59 }
 0x562   : > { %1540 = vst [vmem:[#allocation2 + $0x18] sm:$0xf] %v1538_v11  ;;  %1541 = vst [vmem:[#allocation2 + $0x10] sm:$0xf] %v1539_v9  ;;  %v1485_v16 = vpop.permute.xlu1 %1484 }
 0x563   : > { %v1486_v52 = vsel %vm443_vm2, %v1483_v49, %v1485_v16  ;;  %v1487_v27 = vsel %vm443_vm2, %v1485_v16, %v1483_v49 }
 0x564   : > { %v1488_v38 = vmul.f32 %v1487_v27, %v2807_v35  ;;  %v1489_v14 = vmul.f32 %v1486_v52, %v2808_v47 }
 0x566   : > { %1490 = vst [vmem:[#allocation2 + $0x30] sm:$0xf] %v1488_v38  ;;  %1491 = vst [vmem:[#allocation2] sm:$0xf] %v1489_v14 }
 0x569   : > { %v1676_v53 = vld [vmem:[#allocation2 + $0x10] sm:$0xff]  ;;  %v1675_v45 = vld [vmem:[#allocation2 + $0x18] sm:$0xff] }
 0x56a   : > { %1727 = vmatprep.subr.mxu1 %v1676_v53 }
 0x56b   : > { %1728 = vmatpush1.msra.mxu1 %v1675_v45 }
 0x56d   : > { %v1674_v54 = vld [vmem:[#allocation2] sm:$0xff]  ;;  %v1673_v44 = vld [vmem:[#allocation2 + $0x30] sm:$0xff]  ;;  %v1687_v13 = vpop.permute.xlu0 %1686 }
 0x56e   : > { %1729 = vmatprep.subr.mxu1 %v1674_v54 }
 0x56f   : > { %1730 = vmatpush1.msra.mxu1 %v1673_v44 }
 0x570   : > { %1893 = vmatmul.mubr.msk.f32.vlgmr.msra.gmra.mxu1 %vm1689_vm12, %v1672_v12 }
 0x630   : > { %v1765_v39 = vpop.f32.mrf.mxu1 }
 0x631   : > { %v1766_v25 = vadd.f32 %v1765_v39, %v1687_v13 }
 0x632   : > { %v1767_v24 = vpop.f32.mrf.mxu1 }
 0x633   : > { %v1768_v42 = vadd.f32 %v1767_v24, %v1687_v13 }
 0x635   : > { %v1772_v60 = vcombine.low %v1766_v25, %v1768_v42 }
 0x637   : > { %1774 = vst [vmem:[%s307_s20] sm:$0xff] %v1772_v60 }
 0x638 PF: > { %s18_s27 = sadd.s32 1, %s1995_s27  }
 0x639   : > { %p15_p4 = scmp.ge.s32.totalorder %s18_s27, 4  }
 0x63b   :  { %17 = sbr.rel (!%p15_p4) target bundleno = 1 (0x1), region = 97 }

</bundles_post_ra>
